<compile_context>
chip_gen: v7x
topology: tpu7x:2x2x1
jax: 0.10.0
libtpu: 0.0.40
codegen_flags: <defaults>
</compile_context>

<pallas_src>
import functools

import numpy as np
import jax
import jax.numpy as jnp
from jax.experimental import pallas as pl
from jax.experimental.pallas import tpu as pltpu


# ------------------------------- Pallas kernel ------------------------------ #

def _conv_tap_kernel(x_ref, w_ref, b_ref, mask_ref, o_ref, *,
                     shifts, m_out, norm_count, fuse_norm, apply_lrelu, eps, slope):
    """Fused 3x3 conv (+ bias [+ InstanceNorm] [+ LeakyReLU]) for one image.

    x_ref:    (M_in, Ck)    bf16  flat zero-padded activation of one image
    w_ref:    (T, Ck, Cout) bf16  per-tap weight matrices (VMEM resident)
    b_ref:    (1, Cout)     f32   bias
    mask_ref: (m_out, 1)    f32   1.0 at valid output positions, 0.0 at junk positions
    o_ref:    (m_out, Cout)       output (bf16 intermediates / f32 head)

    Taps are built in VMEM as statically shifted row windows of the flat input block,
    so no im2col buffer ever exists in HBM; accumulation is f32 on the MXU.
    """
    cout = o_ref.shape[-1]
    acc = jnp.zeros((m_out, cout), jnp.float32)
    for t, s in enumerate(shifts):
        tap = x_ref[pl.ds(s, m_out), :]                               # (m_out, Ck) bf16
        acc = acc + jnp.dot(tap, w_ref[t], preferred_element_type=jnp.float32)
    acc = acc + b_ref[...]

    if fuse_norm:
        # InstanceNorm2d(affine=False): per-channel stats over the valid positions of
        # this image (junk seam columns / phantom rows masked out), biased variance.
        mask = mask_ref[...]
        inv_n = 1.0 / float(norm_count)
        mean = jnp.sum(acc * mask, axis=0, keepdims=True) * inv_n
        diff = acc - mean
        var = jnp.sum(diff * diff * mask, axis=0, keepdims=True) * inv_n
        acc = diff * jax.lax.rsqrt(var + eps)

    if apply_lrelu:
        acc = jnp.where(acc >= 0.0, acc, slope * acc)

    o_ref[...] = acc.astype(o_ref.dtype)


# ------------------------------ kernel wrapper ------------------------------ #

@functools.partial(jax.jit,
                   static_argnames=("stride", "fuse_norm", "apply_lrelu", "out_f32"))
def conv3x3(x, w, b, *, stride, fuse_norm, apply_lrelu, out_f32=False):
    """3x3 'same' conv (stride 1 or 2) with fused bias / InstanceNorm / LeakyReLU.

    x: (N, H, W, Cin) float (used as bf16); w: (3,3,Cin,Cout) f32; b: (Cout,) f32.
    Returns (N, Ho, Wo, Cout), bf16 unless out_f32."""
    N, H, W, Cin = x.shape
    Cout = w.shape[-1]
    Ho = (H - 1) // stride + 1
    Wo = (W - 1) // stride + 1

    # Single zero-pad of the activation (bf16): +2 bottom rows give the shifted row
    # windows enough slack; the extra right column keeps the padded width even for the
    # stride-2 channel fold.
    pad_w_hi = 2 if (stride == 2 and W % 2 == 1) else 1
    xp = jnp.pad(x.astype(jnp.bfloat16), ((0, 0), (1, 2), (1, pad_w_hi), (0, 0)))
    Hp = H + 3
    Wp = W + 1 + pad_w_hi

    if stride == 1:
        w_step, ck = Wp, Cin
        xf = xp.reshape(N, Hp * w_step, ck)                           # free reshape
        shifts = tuple(ky * w_step + kx for ky in range(3) for kx in range(3))
        w_taps = jnp.stack([w[ky, kx] for ky in range(3) for kx in range(3)], 0)
    else:
        # Fold W parity into channels (free reshape): padded column 2j -> channels
        # [0:Cin] of flat position j, column 2j+1 -> channels [Cin:2Cin].  The three
        # kx taps then collapse to two contiguous row windows per ky.
        w_step, ck = Wp // 2, 2 * Cin
        xf = xp.reshape(N, Hp * w_step, ck)                           # free reshape
        shifts = tuple(ky * w_step + d for ky in range(3) for d in (0, 1))
        wl = []
        for ky in range(3):
            wl.append(jnp.concatenate([w[ky, 0], w[ky, 1]], axis=0))
            wl.append(jnp.concatenate([w[ky, 2], jnp.zeros_like(w[ky, 2])], axis=0))
        w_taps = jnp.stack(wl, 0)
    w_taps = w_taps.astype(jnp.bfloat16)
    bk = b.astype(jnp.float32).reshape(1, Cout)

    n_rows = stride * (Ho - 1) + 1
    m_out = n_rows * w_step
    m_in = xf.shape[1]
    n_taps = len(shifts)
    assert max(shifts) + m_out <= m_in

    # Static 0/1 mask of valid output positions (excludes the right seam columns and,
    # for stride 2, the phantom odd rows).  Used only for the fused-norm statistics.
    p = np.arange(m_out)
    valid = (p % w_step < Wo) & ((p // w_step) % stride == 0)
    mask = jnp.asarray(valid.astype(np.float32).reshape(m_out, 1))

    out_dtype = jnp.float32 if out_f32 else jnp.bfloat16

    # VMEM request sized from the actual footprint (pipelined in/out blocks, resident
    # weights/bias/mask, f32 accumulator, tap slack) - stays well under v7x's 64 MiB.
    out_bytes = m_out * Cout * (4 if out_f32 else 2)
    est = (2 * (m_in * ck * 2 + out_bytes + m_out * 4)
           + n_taps * ck * Cout * 2 + Cout * 4
           + 4 * m_out * Cout + 2 * m_out * ck)
    vmem_limit = int(min(max(4 * est, 16 * 2 ** 20), 48 * 2 ** 20))

    out = pl.pallas_call(
        functools.partial(
            _conv_tap_kernel, shifts=shifts, m_out=m_out, norm_count=Ho * Wo,
            fuse_norm=fuse_norm, apply_lrelu=apply_lrelu, eps=1e-5, slope=0.2),
        out_shape=jax.ShapeDtypeStruct((N, m_out, Cout), out_dtype),
        grid=(N,),
        in_specs=[
            pl.BlockSpec((None, m_in, ck), lambda n: (n, 0, 0)),       # per-image act
            pl.BlockSpec((n_taps, ck, Cout), lambda n: (0, 0, 0)),     # weights, resident
            pl.BlockSpec((1, Cout), lambda n: (0, 0)),                 # bias, resident
            pl.BlockSpec((m_out, 1), lambda n: (0, 0)),                # mask, resident
        ],
        out_specs=pl.BlockSpec((None, m_out, Cout), lambda n: (n, 0, 0)),
        compiler_params=pltpu.CompilerParams(
            dimension_semantics=("parallel",),
            vmem_limit_bytes=vmem_limit),
    )(xf, w_taps, bk, mask)

    # Drop seam columns / phantom rows (junk positions never re-enter a kernel).
    return out.reshape(N, n_rows, w_step, Cout)[:, ::stride, :Wo, :]


# ------------------------- PatchGAN model definition ------------------------ #

def build_patchgan_params(key, input_nc, ndf=64, n_layers=3):
    """Replicates the PyTorch PatchGAN layer sequence (FC_bottleneck=False,
    norm_layer=InstanceNorm2d -> use_bias=True).  Weights ~ N(0, 0.02), deterministic."""
    cfg = [(input_nc, ndf, 1, False, True),           # (cin, cout, stride, norm, lrelu)
           (ndf, ndf, 2, False, True)]
    nf_mult = 1
    for n in range(1, n_layers):
        nf_mult_prev, nf_mult = nf_mult, min(2 ** n, 8)
        cfg.append((ndf * nf_mult_prev, ndf * nf_mult, 1, True, True))
        cfg.append((ndf * nf_mult, ndf * nf_mult, 2, True, True))
    nf_mult_prev, nf_mult = nf_mult, min(2 ** n_layers, 8)
    cfg.append((ndf * nf_mult_prev, ndf * nf_mult, 1, True, True))
    cfg.append((ndf * nf_mult, 1, 1, False, False))    # final 1-channel prediction head

    params = []
    for (cin, cout, stride, norm, act) in cfg:
        key, kw, kb = jax.random.split(key, 3)
        params.append(dict(
            w=0.02 * jax.random.normal(kw, (3, 3, cin, cout), jnp.float32),
            b=0.02 * jax.random.normal(kb, (cout,), jnp.float32),
            stride=stride, norm=norm, act=act))
    return params


def patchgan_forward(x_nchw, params, crop_center):
    """Standard forward (layers=[] / encode_only=False path of the PyTorch module)."""
    # TODO(synk): the intermediate-feature path (layers / encode_only) and the
    # FC_bottleneck=True branch are not reproduced; only the standard forward is here.
    if crop_center is not None:
        _, _, h, w = x_nchw.shape
        x0 = (h - crop_center) // 2
        y0 = (w - crop_center) // 2
        x_nchw = x_nchw[:, :, x0:x0 + crop_center, y0:y0 + crop_center]

    x = jnp.transpose(x_nchw, (0, 2, 3, 1))            # NCHW -> NHWC
    last = len(params) - 1
    for i, p in enumerate(params):
        x = conv3x3(x, p["w"], p["b"], stride=p["stride"],
                    fuse_norm=p["norm"], apply_lrelu=p["act"],
                    out_f32=(i == last))
    return jnp.transpose(x, (0, 3, 1, 2))              # NHWC -> NCHW


# ---------------------------- pure-JAX reference ---------------------------- #

def _reference_forward(x_nchw, params, crop_center):
    if crop_center is not None:
        _, _, h, w = x_nchw.shape
        x0 = (h - crop_center) // 2
        y0 = (w - crop_center) // 2
        x_nchw = x_nchw[:, :, x0:x0 + crop_center, y0:y0 + crop_center]
    x = jnp.transpose(x_nchw, (0, 2, 3, 1)).astype(jnp.float32)
    for p in params:
        x = jax.lax.conv_general_dilated(
            x, p["w"], window_strides=(p["stride"],) * 2,
            padding=((1, 1), (1, 1)),
            dimension_numbers=("NHWC", "HWIO", "NHWC")) + p["b"]
        if p["norm"]:
            mean = jnp.mean(x, axis=(1, 2), keepdims=True)
            var = jnp.var(x, axis=(1, 2), keepdims=True)
            x = (x - mean) * jax.lax.rsqrt(var + 1e-5)
        if p["act"]:
            x = jnp.where(x >= 0, x, 0.2 * x)
    return jnp.transpose(x, (0, 3, 1, 2))


# ----------------------------------- main ----------------------------------- #

if __name__ == "__main__":
    key = jax.random.PRNGKey(0)
    k_x, k_p = jax.random.split(key)

    # Small config consistent with the module: input_nc=4, ndf=8, n_layers=3, crop 16.
    N, C, H, W = 2, 4, 32, 32
    crop_center = 16
    ndf, n_layers = 8, 3

    x = jax.random.normal(k_x, (N, C, H, W), jnp.float32)
    params = build_patchgan_params(k_p, input_nc=C, ndf=ndf, n_layers=n_layers)

    out = patchgan_forward(x, params, crop_center)
    out = jax.block_until_ready(out)

    # After crop 16 and three stride-2 convs: spatial 16 -> 8 -> 4 -> 2, 1 channel.
    assert out.shape == (N, 1, 2, 2), out.shape
    assert bool(jnp.all(jnp.isfinite(out)))

    # Numerical check against a plain-JAX reference (bf16 operands / f32 accumulation
    # in the kernel -> expect ~1e-2-level error; tolerance is generous).
    ref = _reference_forward(x, params, crop_center)
    err = float(jnp.max(jnp.abs(out.astype(jnp.float32) - ref)))
    assert err < 0.1, f"max abs err vs reference: {err}"

    print("KERNEL_OK")
</pallas_src>

<mosaic_0001>
module attributes {stable_mosaic.version = 11 : i64} {
  func.func @_conv_tap_kernel(%arg0: i32, %arg1: memref<1x342x4xbf16, #tpu.memory_space<vmem>>, %arg2: memref<9x4x8xbf16, #tpu.memory_space<vmem>>, %arg3: memref<1x8xf32, #tpu.memory_space<vmem>>, %arg4: memref<288x1xf32, #tpu.memory_space<vmem>>, %arg5: memref<1x288x8xbf16, #tpu.memory_space<vmem>>) attributes {dimension_semantics = [#tpu.dimension_semantics<parallel>], iteration_bounds = array<i64: 2>, scalar_prefetch = 0 : i64, scratch_operands = 0 : i64, tpu.core_type = #tpu.core_type<tc>, window_params = [{transform_indices = @transform_0, window_bounds = array<i64: 1, 342, 4>}, {pipeline_mode = #tpu.pipeline_mode<synchronous>, transform_indices = @transform_1, window_bounds = array<i64: 9, 4, 8>}, {pipeline_mode = #tpu.pipeline_mode<synchronous>, transform_indices = @transform_2, window_bounds = array<i64: 1, 8>}, {pipeline_mode = #tpu.pipeline_mode<synchronous>, transform_indices = @transform_3, window_bounds = array<i64: 288, 1>}, {transform_indices = @transform_4, window_bounds = array<i64: 1, 288, 8>}]} {
    %cst = arith.constant 0.000000e+00 : f32
    %0 = vector.broadcast %cst : f32 to vector<288x8xf32>
    %c0 = arith.constant 0 : index
    %c0_0 = arith.constant 0 : index
    %c0_1 = arith.constant 0 : index
    %1 = vector.load %arg1[%c0, %c0_0, %c0_1] : memref<1x342x4xbf16, #tpu.memory_space<vmem>>, vector<1x288x4xbf16>
    %2 = vector.shape_cast %1 : vector<1x288x4xbf16> to vector<288x4xbf16>
    %c0_2 = arith.constant 0 : index
    %c0_3 = arith.constant 0 : index
    %c0_4 = arith.constant 0 : index
    %3 = vector.load %arg2[%c0_2, %c0_3, %c0_4] : memref<9x4x8xbf16, #tpu.memory_space<vmem>>, vector<1x4x8xbf16>
    %4 = vector.shape_cast %3 : vector<1x4x8xbf16> to vector<4x8xbf16>
    %cst_5 = arith.constant dense<0.000000e+00> : vector<288x8xf32>
    %5 = tpu.matmul %2, %4, %cst_5 {dimension_numbers = #tpu.dot_dimension_numbers<[1], [0], [0], [1], [0, 0, 1, 1], [], []>} : vector<288x4xbf16>, vector<4x8xbf16>, vector<288x8xf32> -> vector<288x8xf32>
    %6 = arith.addf %0, %5 : vector<288x8xf32>
    %c0_6 = arith.constant 0 : index
    %c1 = arith.constant 1 : index
    %c0_7 = arith.constant 0 : index
    %7 = vector.load %arg1[%c0_6, %c1, %c0_7] : memref<1x342x4xbf16, #tpu.memory_space<vmem>>, vector<1x288x4xbf16>
    %8 = vector.shape_cast %7 : vector<1x288x4xbf16> to vector<288x4xbf16>
    %c1_8 = arith.constant 1 : index
    %c0_9 = arith.constant 0 : index
    %c0_10 = arith.constant 0 : index
    %9 = vector.load %arg2[%c1_8, %c0_9, %c0_10] : memref<9x4x8xbf16, #tpu.memory_space<vmem>>, vector<1x4x8xbf16>
    %10 = vector.shape_cast %9 : vector<1x4x8xbf16> to vector<4x8xbf16>
    %cst_11 = arith.constant dense<0.000000e+00> : vector<288x8xf32>
    %11 = tpu.matmul %8, %10, %cst_11 {dimension_numbers = #tpu.dot_dimension_numbers<[1], [0], [0], [1], [0, 0, 1, 1], [], []>} : vector<288x4xbf16>, vector<4x8xbf16>, vector<288x8xf32> -> vector<288x8xf32>
    %12 = arith.addf %6, %11 : vector<288x8xf32>
    %c0_12 = arith.constant 0 : index
    %c2 = arith.constant 2 : index
    %c0_13 = arith.constant 0 : index
    %13 = vector.load %arg1[%c0_12, %c2, %c0_13] : memref<1x342x4xbf16, #tpu.memory_space<vmem>>, vector<1x288x4xbf16>
    %14 = vector.shape_cast %13 : vector<1x288x4xbf16> to vector<288x4xbf16>
    %c2_14 = arith.constant 2 : index
    %c0_15 = arith.constant 0 : index
    %c0_16 = arith.constant 0 : index
    %15 = vector.load %arg2[%c2_14, %c0_15, %c0_16] : memref<9x4x8xbf16, #tpu.memory_space<vmem>>, vector<1x4x8xbf16>
    %16 = vector.shape_cast %15 : vector<1x4x8xbf16> to vector<4x8xbf16>
    %cst_17 = arith.constant dense<0.000000e+00> : vector<288x8xf32>
    %17 = tpu.matmul %14, %16, %cst_17 {dimension_numbers = #tpu.dot_dimension_numbers<[1], [0], [0], [1], [0, 0, 1, 1], [], []>} : vector<288x4xbf16>, vector<4x8xbf16>, vector<288x8xf32> -> vector<288x8xf32>
    %18 = arith.addf %12, %17 : vector<288x8xf32>
    %c0_18 = arith.constant 0 : index
    %c18 = arith.constant 18 : index
    %c0_19 = arith.constant 0 : index
    %19 = vector.load %arg1[%c0_18, %c18, %c0_19] : memref<1x342x4xbf16, #tpu.memory_space<vmem>>, vector<1x288x4xbf16>
    %20 = vector.shape_cast %19 : vector<1x288x4xbf16> to vector<288x4xbf16>
    %c3 = arith.constant 3 : index
    %c0_20 = arith.constant 0 : index
    %c0_21 = arith.constant 0 : index
    %21 = vector.load %arg2[%c3, %c0_20, %c0_21] : memref<9x4x8xbf16, #tpu.memory_space<vmem>>, vector<1x4x8xbf16>
    %22 = vector.shape_cast %21 : vector<1x4x8xbf16> to vector<4x8xbf16>
    %cst_22 = arith.constant dense<0.000000e+00> : vector<288x8xf32>
    %23 = tpu.matmul %20, %22, %cst_22 {dimension_numbers = #tpu.dot_dimension_numbers<[1], [0], [0], [1], [0, 0, 1, 1], [], []>} : vector<288x4xbf16>, vector<4x8xbf16>, vector<288x8xf32> -> vector<288x8xf32>
    %24 = arith.addf %18, %23 : vector<288x8xf32>
    %c0_23 = arith.constant 0 : index
    %c19 = arith.constant 19 : index
    %c0_24 = arith.constant 0 : index
    %25 = vector.load %arg1[%c0_23, %c19, %c0_24] : memref<1x342x4xbf16, #tpu.memory_space<vmem>>, vector<1x288x4xbf16>
    %26 = vector.shape_cast %25 : vector<1x288x4xbf16> to vector<288x4xbf16>
    %c4 = arith.constant 4 : index
    %c0_25 = arith.constant 0 : index
    %c0_26 = arith.constant 0 : index
    %27 = vector.load %arg2[%c4, %c0_25, %c0_26] : memref<9x4x8xbf16, #tpu.memory_space<vmem>>, vector<1x4x8xbf16>
    %28 = vector.shape_cast %27 : vector<1x4x8xbf16> to vector<4x8xbf16>
    %cst_27 = arith.constant dense<0.000000e+00> : vector<288x8xf32>
    %29 = tpu.matmul %26, %28, %cst_27 {dimension_numbers = #tpu.dot_dimension_numbers<[1], [0], [0], [1], [0, 0, 1, 1], [], []>} : vector<288x4xbf16>, vector<4x8xbf16>, vector<288x8xf32> -> vector<288x8xf32>
    %30 = arith.addf %24, %29 : vector<288x8xf32>
    %c0_28 = arith.constant 0 : index
    %c20 = arith.constant 20 : index
    %c0_29 = arith.constant 0 : index
    %31 = vector.load %arg1[%c0_28, %c20, %c0_29] : memref<1x342x4xbf16, #tpu.memory_space<vmem>>, vector<1x288x4xbf16>
    %32 = vector.shape_cast %31 : vector<1x288x4xbf16> to vector<288x4xbf16>
    %c5 = arith.constant 5 : index
    %c0_30 = arith.constant 0 : index
    %c0_31 = arith.constant 0 : index
    %33 = vector.load %arg2[%c5, %c0_30, %c0_31] : memref<9x4x8xbf16, #tpu.memory_space<vmem>>, vector<1x4x8xbf16>
    %34 = vector.shape_cast %33 : vector<1x4x8xbf16> to vector<4x8xbf16>
    %cst_32 = arith.constant dense<0.000000e+00> : vector<288x8xf32>
    %35 = tpu.matmul %32, %34, %cst_32 {dimension_numbers = #tpu.dot_dimension_numbers<[1], [0], [0], [1], [0, 0, 1, 1], [], []>} : vector<288x4xbf16>, vector<4x8xbf16>, vector<288x8xf32> -> vector<288x8xf32>
    %36 = arith.addf %30, %35 : vector<288x8xf32>
    %c0_33 = arith.constant 0 : index
    %c36 = arith.constant 36 : index
    %c0_34 = arith.constant 0 : index
    %37 = vector.load %arg1[%c0_33, %c36, %c0_34] : memref<1x342x4xbf16, #tpu.memory_space<vmem>>, vector<1x288x4xbf16>
    %38 = vector.shape_cast %37 : vector<1x288x4xbf16> to vector<288x4xbf16>
    %c6 = arith.constant 6 : index
    %c0_35 = arith.constant 0 : index
    %c0_36 = arith.constant 0 : index
    %39 = vector.load %arg2[%c6, %c0_35, %c0_36] : memref<9x4x8xbf16, #tpu.memory_space<vmem>>, vector<1x4x8xbf16>
    %40 = vector.shape_cast %39 : vector<1x4x8xbf16> to vector<4x8xbf16>
    %cst_37 = arith.constant dense<0.000000e+00> : vector<288x8xf32>
    %41 = tpu.matmul %38, %40, %cst_37 {dimension_numbers = #tpu.dot_dimension_numbers<[1], [0], [0], [1], [0, 0, 1, 1], [], []>} : vector<288x4xbf16>, vector<4x8xbf16>, vector<288x8xf32> -> vector<288x8xf32>
    %42 = arith.addf %36, %41 : vector<288x8xf32>
    %c0_38 = arith.constant 0 : index
    %c37 = arith.constant 37 : index
    %c0_39 = arith.constant 0 : index
    %43 = vector.load %arg1[%c0_38, %c37, %c0_39] : memref<1x342x4xbf16, #tpu.memory_space<vmem>>, vector<1x288x4xbf16>
    %44 = vector.shape_cast %43 : vector<1x288x4xbf16> to vector<288x4xbf16>
    %c7 = arith.constant 7 : index
    %c0_40 = arith.constant 0 : index
    %c0_41 = arith.constant 0 : index
    %45 = vector.load %arg2[%c7, %c0_40, %c0_41] : memref<9x4x8xbf16, #tpu.memory_space<vmem>>, vector<1x4x8xbf16>
    %46 = vector.shape_cast %45 : vector<1x4x8xbf16> to vector<4x8xbf16>
    %cst_42 = arith.constant dense<0.000000e+00> : vector<288x8xf32>
    %47 = tpu.matmul %44, %46, %cst_42 {dimension_numbers = #tpu.dot_dimension_numbers<[1], [0], [0], [1], [0, 0, 1, 1], [], []>} : vector<288x4xbf16>, vector<4x8xbf16>, vector<288x8xf32> -> vector<288x8xf32>
    %48 = arith.addf %42, %47 : vector<288x8xf32>
    %c0_43 = arith.constant 0 : index
    %c38 = arith.constant 38 : index
    %c0_44 = arith.constant 0 : index
    %49 = vector.load %arg1[%c0_43, %c38, %c0_44] : memref<1x342x4xbf16, #tpu.memory_space<vmem>>, vector<1x288x4xbf16>
    %50 = vector.shape_cast %49 : vector<1x288x4xbf16> to vector<288x4xbf16>
    %c8 = arith.constant 8 : index
    %c0_45 = arith.constant 0 : index
    %c0_46 = arith.constant 0 : index
    %51 = vector.load %arg2[%c8, %c0_45, %c0_46] : memref<9x4x8xbf16, #tpu.memory_space<vmem>>, vector<1x4x8xbf16>
    %52 = vector.shape_cast %51 : vector<1x4x8xbf16> to vector<4x8xbf16>
    %cst_47 = arith.constant dense<0.000000e+00> : vector<288x8xf32>
    %53 = tpu.matmul %50, %52, %cst_47 {dimension_numbers = #tpu.dot_dimension_numbers<[1], [0], [0], [1], [0, 0, 1, 1], [], []>} : vector<288x4xbf16>, vector<4x8xbf16>, vector<288x8xf32> -> vector<288x8xf32>
    %54 = arith.addf %48, %53 : vector<288x8xf32>
    %c0_48 = arith.constant 0 : index
    %c0_49 = arith.constant 0 : index
    %55 = vector.load %arg3[%c0_48, %c0_49] : memref<1x8xf32, #tpu.memory_space<vmem>>, vector<1x8xf32>
    %56 = vector.broadcast %55 : vector<1x8xf32> to vector<288x8xf32>
    %57 = arith.addf %54, %56 : vector<288x8xf32>
    %cst_50 = arith.constant 0.000000e+00 : f32
    %58 = vector.broadcast %cst_50 : f32 to vector<288x8xf32>
    %59 = arith.cmpf oge, %57, %58 : vector<288x8xf32>
    %cst_51 = arith.constant 2.000000e-01 : f32
    %60 = vector.broadcast %cst_51 : f32 to vector<288x8xf32>
    %61 = arith.mulf %60, %57 : vector<288x8xf32>
    %62 = arith.select %59, %57, %61 : vector<288x8xi1>, vector<288x8xf32>
    %63 = arith.truncf %62 : vector<288x8xf32> to vector<288x8xbf16>
    %c0_52 = arith.constant 0 : index
    %c0_53 = arith.constant 0 : index
    %c0_54 = arith.constant 0 : index
    %64 = vector.load %arg5[%c0_52, %c0_53, %c0_54] : memref<1x288x8xbf16, #tpu.memory_space<vmem>>, vector<1x288x8xbf16>
    %65 = vector.shape_cast %64 : vector<1x288x8xbf16> to vector<288x8xbf16>
    %66 = vector.shape_cast %63 : vector<288x8xbf16> to vector<1x288x8xbf16>
    tpu.vector_store %arg5[%c0_52, %c0_53, %c0_54], %66 {strides = array<i32>} : memref<1x288x8xbf16, #tpu.memory_space<vmem>>, vector<1x288x8xbf16>,
    return
  }
  func.func @transform_0(%arg0: i32) -> (i32, i32, i32) {
    %c0_i32 = arith.constant 0 : i32
    %c0_i32_0 = arith.constant 0 : i32
    %c0_i32_1 = arith.constant 0 : i32
    return %arg0, %c0_i32, %c0_i32_0 : i32, i32, i32
  }
  func.func @transform_1(%arg0: i32) -> (i32, i32, i32) {
    %c0_i32 = arith.constant 0 : i32
    %c0_i32_0 = arith.constant 0 : i32
    %c0_i32_1 = arith.constant 0 : i32
    %c0_i32_2 = arith.constant 0 : i32
    return %c0_i32, %c0_i32_0, %c0_i32_1 : i32, i32, i32
  }
  func.func @transform_2(%arg0: i32) -> (i32, i32) {
    %c0_i32 = arith.constant 0 : i32
    %c0_i32_0 = arith.constant 0 : i32
    %c0_i32_1 = arith.constant 0 : i32
    return %c0_i32, %c0_i32_0 : i32, i32
  }
  func.func @transform_3(%arg0: i32) -> (i32, i32) {
    %c0_i32 = arith.constant 0 : i32
    %c0_i32_0 = arith.constant 0 : i32
    %c0_i32_1 = arith.constant 0 : i32
    return %c0_i32, %c0_i32_0 : i32, i32
  }
  func.func @transform_4(%arg0: i32) -> (i32, i32, i32) {
    %c0_i32 = arith.constant 0 : i32
    %c0_i32_0 = arith.constant 0 : i32
    %c0_i32_1 = arith.constant 0 : i32
    return %arg0, %c0_i32, %c0_i32_0 : i32, i32, i32
  }
}

</mosaic_0001>

<bundles_post_ra>
// kernel: conv3x3.1
= control target key start
LH: loop header
LB: loop body
LE: loop exit
PB: predicated region body
PF: predicated region fallthrough
CT: control target
= control target key end

     0   :  { %s5277_s15 = smov 0   ;;  %s6249_s0 = inlined_call_operand.vmem [shape: bf16[2,342,4], index: 0, kind: input, shape index: {}]   ;;  %s6250_s1 = inlined_call_operand.vmem [shape: bf16[9,4,8], index: 1, kind: input, shape index: {}]   ;;  %s6251_s2 = inlined_call_operand.vmem [shape: f32[1,8], index: 2, kind: input, shape index: {}]   ;;  %s6252_s3 = inlined_call_operand.vmem [shape: f32[288,1], index: 3, kind: input, shape index: {}]   ;;  %s6253_s4 = inlined_call_operand.vmem [shape: bf16[2,288,8], index: 4, kind: output, shape index: {}]  }
   0x1 LB: > { %s4034_s16 = sadd.s32 4294967295, %s5250_s15   ;;  %p4038_p0 = scmp.ge.s32.totalorder %s5250_s15, 1  ;;  %s5250_s15 = sphi %s5277_s15, %s14_s15  }
   0x2   : > { %p162_p1 = scmp.lt.s32.totalorder %s5250_s15, 3 }
   0x4   : > { %p163_p2 = pnand %p4038_p0, %p162_p1 }
   0x5   : > { %vm536_vm0 = vcmask (!%p163_p2), 1041408   ;;  %v4155_v0 = vld [vmem:[%s6250_s1 + $0x8] sm:$0x3] (!%p163_p2)  ;;  %v4041_v1 = vld [vmem:[%s6250_s1 + $0x2] sm:$0x3] (!%p163_p2)  ;;  %p188_p3 = scmp.lt.s32.totalorder (!%p163_p2), %s4034_s16, 1 }
   0x6   : > { %166 = sbr.rel (%p163_p2) target bundleno = 576 (0x240), region = 36  ;;  %5155 = vmatprep.subr.msk.bf16.mxu0 (!%p163_p2), %vm536_vm0, %v4155_v0  ;;  %5151 = vmatprep.subr.msk.bf16.mxu1 (!%p163_p2), %vm536_vm0, %v4041_v1  ;;  %v5294_v2 = vsel (!%p163_p2), %vm536_vm0, %v4155_v0, 0  ;;  %v538_v3 = vsel (!%p163_p2), %vm536_vm0, %v4041_v1, 0  ;;  %v4175_v4 = vld [vmem:[%s6250_s1 + $0xa] sm:$0x3] (!%p163_p2)  ;;  %vm481_vm2 = vcmask (!%p163_p2), 31744  }
   0x7   : > { %4672 = vmatpush3.bf16.msra.mxu0 (!%p163_p2), %v5294_v2  ;;  %4520 = vmatpush3.bf16.msra.mxu1 (!%p163_p2), %v538_v3  ;;  %v235_v5 = vld [vmem:[%s6250_s1] sm:$0x3] (!%p163_p2)  ;;  %vm332_vm1 = vsmask.f32 (!%p163_p2), 7424  ;;  %v5315_v6 = vsel (!%p163_p2), %vm536_vm0, %v4175_v4, 0  ;;  %vm2139_vm4 = vcmask (!%p163_p2), 1045504  }
   0x8   : > { %5157 = vmatprep.subr.msk.bf16.mxu0 (!%p163_p2), %vm536_vm0, %v4175_v4  ;;  %5152 = vmatprep.subr.msk.bf16.mxu1 (!%p163_p2), %vm536_vm0, %v235_v5  ;;  %vm1692_vm3 = vsmask.f32 (!%p163_p2), 6400  ;;  %v754_v12 = vsel (!%p163_p2), %vm536_vm0, %v235_v5, 0  ;;  %v5363_v39 = vld [vmem:[%s6250_s1 + $0x4] sm:$0x3] (!%p163_p2)  ;;  %vm939_vm5 = vcmask (!%p163_p2), 1046528  }
   0x9   : > { %v5397_v1 = vld [vmem:[%s6250_s1 + $0xc] sm:$0x3] (!%p163_p2)  ;;  %vm2892_vm6 = vsmask.f32 (!%p163_p2), 5376  ;;  %vm3339_vm7 = vcmask (!%p163_p2), 1044480   ;;  %vm3942_vm10 = vcmask (!%p163_p2), 60416  }
   0xd   : > { %s6255_s16 = smov (!%p188_p3, %s4034_s16), 1 }
   0xe   : > { %s5161_s24 = smul.u32 172, %s6255_s16 }
   0xf   : > { %s5162_s17 = smul.u32 144, %s6255_s16 }
  0x10   : > { %s5312_s27 = scalar_lea.vmem %s6249_s0, %s5161_s24 }
  0x11   : > { %v199_v7 = vld [vmem:[%s5312_s27] sm:$0xf]  ;;  %v5319_v8 = vld [vmem:[%s5312_s27 + $0x4] sm:$0xf]  ;;  %v5325_v10 = vld [vmem:[%s5312_s27 + $0x8] sm:$0xff]   ;;  %s6128_s20 = scalar_lea.vmem %s6253_s4, %s5162_s17 }
  0x12   : > { %v5322_v9 = vcombine.low %v199_v7, %v5319_v8  ;;  %v1247_v11 = vld [vmem:[%s5312_s27 + $0x8] sm:$0xe]  ;;  %v5330_v13 = vld [vmem:[%s5312_s27 + $0xc] sm:$0xf]  ;;  %v341_v16 = vshll.u32 %v5325_v10, 16  ;;  %v345_v17 = vshrl.u32 %v5325_v10, 16 }
  0x13   : > { %v5337_v18 = vld [vmem:[%s5312_s27 + $0x10] sm:$0xff]   ;;  %v5343_v20 = vcombine.low %v1247_v11, %v5330_v13  ;;  %v5351_v28 = vld [vmem:[%s5312_s27 + $0x18] sm:$0xff]   ;;  %v5357_v34 = vld [vmem:[%s5312_s27 + $0x20] sm:$0xff]  }
  0x14   : > { %v334_v14 = vshrl.u32 %v5322_v9, 16  ;;  %v336_v15 = vshll.u32 %v5322_v9, 16  ;;  %v5340_v19 = vld [vmem:[%s5312_s27 + $0x10] sm:$0xff]   ;;  %v343_v22 = vrot.slane %v341_v16, 1  ;;  %v1702_v23 = vshrl.u32 %v5337_v18, 16  ;;  %v5354_v33 = vld [vmem:[%s5312_s27 + $0x18] sm:$0xff]  }
  0x15   : > { %v1705_v24 = vshll.u32 %v5337_v18, 16  ;;  %v1694_v25 = vshrl.u32 %v5343_v20, 16  ;;  %v1697_v26 = vshll.u32 %v5343_v20, 16  ;;  %v349_v27 = vshll.u32 %v5340_v19, 16  ;;  %v5372_v48 = vld [vmem:[%s5312_s27 + $0x20] sm:$0xff]   ;;  %v5375_v49 = vld [vmem:[%s5312_s27 + $0x28] sm:$0xff]  }
  0x16   : > { %v338_v21 = vrot.slane %v336_v15, 1  ;;  %v347_v30 = vor.u32 %v345_v17, %v343_v22  ;;  %v1704_v31 = vrot.slane %v1702_v23, 1  ;;  %v1711_v38 = vshrl.u32 %v5351_v28, 16  ;;  %v5381_v54 = vld [vmem:[%s5312_s27 + $0x28] sm:$0xff]   ;;  %v5387_v59 = vld [vmem:[%s5312_s27 + $0x30] sm:$0xff]   ;;  %v5411_v23 = vld [vmem:[%s5312_s27 + $0x38] sm:$0xff]  }
  0x17   : > { %v1707_v32 = vrot.slane %v1705_v24, 2  ;;  %v1696_v35 = vrot.slane %v1694_v25, 1  ;;  %v1699_v36 = vrot.slane %v1697_v26, 2  ;;  %v351_v37 = vrot.slane %v349_v27, 1  ;;  %v5392_v0 = vld [vmem:[%s5312_s27 + $0x30] sm:$0xff]  }
  0x18   : > { %v339_v29 = vor.u32 %v338_v21, %v334_v14  ;;  %v1714_v42 = vshll.u32 %v5351_v28, 16  ;;  %v353_v43 = vshrl.u32 %v5340_v19, 16  ;;  %v1713_v46 = vrot.slane %v1711_v38, 1 }
  0x19   : > { %v1708_v41 = vor.u32 %v1707_v32, %v1704_v31  ;;  %v1700_v44 = vor.u32 %v1699_v36, %v1696_v35  ;;  %v352_v45 = vsel %vm332_vm1, %v347_v30, %v351_v37  ;;  %v357_v47 = vshll.u32 %v5354_v33, 16  ;;  %v5420_v35 = vld [vmem:[%s5312_s27 + $0x38] sm:$0xff]  }
  0x1a   : > { %v344_v40 = vsel %vm332_vm1, %v339_v29, %v343_v22  ;;  %v1716_v50 = vrot.slane %v1714_v42, 2  ;;  %v355_v51 = vor.u32 %v353_v43, %v351_v37  ;;  %v1720_v52 = vshrl.u32 %v5357_v34, 16 }
  0x1b   : > { %4521 = vmatprep.mubr.msk.bf16.mxu1 %vm481_vm2, %v344_v40  ;;  %v1723_v53 = vshll.u32 %v5357_v34, 16  ;;  %v1709_v55 = vsel %vm1692_vm3, %v1700_v44, %v1708_v41  ;;  %v359_v56 = vrot.slane %v357_v47, 1  ;;  %v361_v57 = vshrl.u32 %v5354_v33, 16  ;;  %v5431_v44 = vld [vmem:[%s5312_s27 + $0x40] sm:$0xff]  }
  0x1c   : > { %4522 = vmatmul.mubr.msk.bf16.vlgmr.msra.gmra.mrb[0].mxu1 %vm481_vm2, %v352_v45  ;;  %v365_v58 = vshll.u32 %v5372_v48, 16  ;;  %4673 = vmatprep.mubr.msk.bf16.mxu0 %vm481_vm2, %v1709_v55  ;;  %v1717_v60 = vor.u32 %v1716_v50, %v1713_v46  ;;  %v1722_v61 = vrot.slane %v1720_v52, 1  ;;  %v1729_v63 = vshrl.u32 %v5375_v49, 16 }
  0x1d   : > { %4558 = vmatpush3.bf16.msra.mxu1 %v754_v12  ;;  %v1725_v62 = vrot.slane %v1723_v53, 2  ;;  %v360_v3 = vsel %vm332_vm1, %v355_v51, %v359_v56  ;;  %v363_v4 = vor.u32 %v361_v57, %v359_v56  ;;  %v1732_v7 = vshll.u32 %v5375_v49, 16  ;;  %v5436_v51 = vld [vmem:[%s5312_s27 + $0x40] sm:$0xff]  }
  0x1e   : > { %5153 = vmatprep.subr.msk.bf16.mxu1 %vm536_vm0, %v5363_v39  ;;  %v367_v5 = vrot.slane %v365_v58, 1  ;;  %v1718_v11 = vsel %vm1692_vm3, %v1708_v41, %v1717_v60  ;;  %4525 = vmatprep.mubr.msk.bf16.mxu1 %vm481_vm2, %v360_v3  ;;  %v1731_v14 = vrot.slane %v1729_v63, 1  ;;  %v369_v15 = vshrl.u32 %v5372_v48, 16  ;;  %v5447_v63 = vld [vmem:[%s5312_s27 + $0x48] sm:$0xff]  }
  0x1f   : > { %v1726_v12 = vor.u32 %v1725_v62, %v1722_v61  ;;  %4674 = vmatmul.mubr.msk.bf16.vlgmr.msra.gmra.mrb[0].mxu0 %vm481_vm2, %v1718_v11  ;;  %v1734_v17 = vrot.slane %v1732_v7, 2  ;;  %v373_v21 = vshll.u32 %v5381_v54, 16  ;;  %v1738_v22 = vshrl.u32 %v5387_v59, 16  ;;  %v5444_v62 = vld [vmem:[%s5312_s27 + $0x48] sm:$0xff]  }
  0x20   : > { %v368_v16 = vsel %vm332_vm1, %v363_v4, %v367_v5  ;;  %4710 = vmatpush3.bf16.msra.mxu0 %v5315_v6  ;;  %v371_v25 = vor.u32 %v369_v15, %v367_v5  ;;  %v1741_v26 = vshll.u32 %v5387_v59, 16  ;;  %v377_v27 = vshrl.u32 %v5381_v54, 16 }
  0x21   : > { %v1727_v24 = vsel %vm1692_vm3, %v1717_v60, %v1726_v12  ;;  %v1735_v29 = vor.u32 %v1734_v17, %v1731_v14  ;;  %v375_v30 = vrot.slane %v373_v21, 1  ;;  %v1740_v31 = vrot.slane %v1738_v22, 1  ;;  %5158 = vmatprep.subr.msk.bf16.mxu0 %vm536_vm0, %v5397_v1  ;;  %v5456_v14 = vld [vmem:[%s5312_s27 + $0x50] sm:$0xff]  }
  0x22   : > { %4677 = vmatprep.mubr.msk.bf16.mxu0 %vm481_vm2, %v1727_v24  ;;  %v381_v32 = vshll.u32 %v5392_v0, 16  ;;  %v1743_v6 = vrot.slane %v1741_v26, 2  ;;  %v1747_v36 = vshrl.u32 %v5411_v23, 16  ;;  %v1750_v37 = vshll.u32 %v5411_v23, 16 }
  0x23   : > { %v385_v38 = vshrl.u32 %v5392_v0, 16  ;;  %v1736_v40 = vsel %vm1692_vm3, %v1726_v12, %v1735_v29  ;;  %v376_v41 = vsel %vm332_vm1, %v371_v25, %v375_v30  ;;  %v379_v42 = vor.u32 %v377_v27, %v375_v30  ;;  %v5464_v25 = vld [vmem:[%s5312_s27 + $0x50] sm:$0xff]  }
  0x24   : > { %4526 = vmatmul.mubr.msk.bf16.gmra.mrb[4].mxu1 %vm481_vm2, %v368_v16  ;;  %v383_v43 = vrot.slane %v381_v32, 1  ;;  %v1744_v45 = vor.u32 %v1743_v6, %v1740_v31  ;;  %v1749_v46 = vrot.slane %v1747_v36, 1  ;;  %v1752_v47 = vrot.slane %v1750_v37, 2 }
  0x25   : > { %4529 = vmatprep.mubr.msk.bf16.mxu1 %vm481_vm2, %v376_v41  ;;  %v389_v50 = vshll.u32 %v5420_v35, 16  ;;  %v1756_v55 = vshrl.u32 %v5431_v44, 16  ;;  %v1759_v56 = vshll.u32 %v5431_v44, 16  ;;  %v393_v61 = vshrl.u32 %v5420_v35, 16  ;;  %v5474_v41 = vld [vmem:[%s5312_s27 + $0x58] sm:$0xff]  }
  0x26   : > { %v384_v52 = vsel %vm332_vm1, %v379_v42, %v383_v43  ;;  %v387_v53 = vor.u32 %v385_v38, %v383_v43  ;;  %v1745_v57 = vsel %vm1692_vm3, %v1735_v29, %v1744_v45  ;;  %v1753_v58 = vor.u32 %v1752_v47, %v1749_v46  ;;  %v5469_v29 = vld [vmem:[%s5312_s27 + $0x58] sm:$0xff]  }
  0x27   : > { %v391_v60 = vrot.slane %v389_v50, 1  ;;  %4678 = vmatmul.mubr.msk.bf16.gmra.mrb[4].mxu0 %vm481_vm2, %v1736_v40  ;;  %v1758_v3 = vrot.slane %v1756_v55, 1  ;;  %v1761_v4 = vrot.slane %v1759_v56, 2  ;;  %v397_v5 = vshll.u32 %v5436_v51, 16 }
  0x28   : > { %v401_v7 = vshrl.u32 %v5436_v51, 16  ;;  %4681 = vmatprep.mubr.msk.bf16.mxu0 %vm481_vm2, %v1745_v57  ;;  %v1765_v12 = vshrl.u32 %v5444_v62, 16  ;;  %v1768_v16 = vshll.u32 %v5444_v62, 16  ;;  %v405_v17 = vshll.u32 %v5447_v63, 16  ;;  %v2133_v57 = vld [vmem:[%s5312_s27 + $0x8] sm:$0xc] }
  0x29   : > { %v392_v11 = vsel %vm332_vm1, %v387_v53, %v391_v60  ;;  %v1762_v15 = vor.u32 %v1761_v4, %v1758_v3  ;;  %v399_v21 = vrot.slane %v397_v5, 1  ;;  %v1774_v22 = vshrl.u32 %v5456_v14, 16 }
  0x2a   : > { %v1777_v24 = vshll.u32 %v5456_v14, 16  ;;  %v1754_v26 = vsel %vm1692_vm3, %v1744_v45, %v1753_v58  ;;  %v395_v27 = vor.u32 %v393_v61, %v391_v60  ;;  %v1767_v30 = vrot.slane %v1765_v12, 1 }
  0x2b   : > { %v1770_v31 = vrot.slane %v1768_v16, 2  ;;  %v403_v32 = vor.u32 %v401_v7, %v399_v21  ;;  %v407_v6 = vrot.slane %v405_v17, 1  ;;  %v1763_v36 = vsel %vm1692_vm3, %v1753_v58, %v1762_v15  ;;  %v5488_v58 = vld [vmem:[%s5312_s27 + $0x60] sm:$0xff]  }
  0x2c   : > { %4530 = vmatmul.mubr.msk.bf16.gmra.mrb[8].mxu1 %vm481_vm2, %v384_v52  ;;  %v1776_v37 = vrot.slane %v1774_v22, 1  ;;  %v1779_v38 = vrot.slane %v1777_v24, 2  ;;  %v413_v40 = vshll.u32 %v5464_v25, 16  ;;  %v400_v42 = vsel %vm332_vm1, %v395_v27, %v399_v21 }
  0x2d   : > { %4533 = vmatprep.mubr.msk.bf16.mxu1 %vm481_vm2, %v392_v11  ;;  %v409_v43 = vshrl.u32 %v5447_v63, 16  ;;  %v1783_v45 = vshrl.u32 %v5469_v29, 16  ;;  %v1786_v46 = vshll.u32 %v5469_v29, 16  ;;  %v1771_v47 = vor.u32 %v1770_v31, %v1767_v30  ;;  %v5493_v11 = vld [vmem:[%s5312_s27 + $0x68] sm:$0xff]  }
  0x2e   : > { %v408_v50 = vsel %vm332_vm1, %v403_v32, %v407_v6  ;;  %v417_v52 = vshrl.u32 %v5464_v25, 16  ;;  %v421_v53 = vshll.u32 %v5474_v41, 16  ;;  %v1780_v55 = vor.u32 %v1779_v38, %v1776_v37  ;;  %v5510_v32 = vld [vmem:[%s5312_s27 + $0x70] sm:$0xff]  }
  0x2f   : > { %4682 = vmatmul.mubr.msk.bf16.gmra.mrb[8].mxu0 %vm481_vm2, %v1754_v26  ;;  %v415_v56 = vrot.slane %v413_v40, 1  ;;  %v411_v60 = vor.u32 %v409_v43, %v407_v6  ;;  %v1785_v61 = vrot.slane %v1783_v45, 1  ;;  %v1788_v3 = vrot.slane %v1786_v46, 2  ;;  %v5516_v40 = vld [vmem:[%s5312_s27 + $0x78] sm:$0xff]  }
  0x30   : > { %4685 = vmatprep.mubr.msk.bf16.mxu0 %vm481_vm2, %v1763_v36  ;;  %v1772_v4 = vsel %vm1692_vm3, %v1762_v15, %v1771_v47  ;;  %v423_v7 = vrot.slane %v421_v53, 1  ;;  %v1781_v12 = vsel %vm1692_vm3, %v1771_v47, %v1780_v55  ;;  %v4176_v16 = vcombine.low %v2133_v57, %v5330_v13 }
  0x31   : > { %v419_v5 = vor.u32 %v417_v52, %v415_v56  ;;  %v429_v17 = vshll.u32 %v5488_v58, 16  ;;  %v416_v21 = vsel %vm332_vm1, %v411_v60, %v415_v56  ;;  %v425_v22 = vshrl.u32 %v5474_v41, 16  ;;  %v5531_v56 = vld [vmem:[%s5312_s27 + $0x80] sm:$0xff]  }
  0x32   : > { %v5502_v15 = vor.u32 %v1788_v3, %v1785_v61  ;;  %v433_v26 = vshrl.u32 %v5488_v58, 16  ;;  %v437_v27 = vshll.u32 %v5493_v11, 16  ;;  %v2140_v13 = vrot.slane %v4176_v16, 2 }
  0x33   : > { %v424_v24 = vsel %vm332_vm1, %v419_v5, %v423_v7  ;;  %v2141_v30 = vrot.slane %v5337_v18, 2  ;;  %v431_v31 = vrot.slane %v429_v17, 1  ;;  %v427_v6 = vor.u32 %v425_v22, %v423_v7 }
  0x34   : > { %4534 = vmatmul.mubr.msk.bf16.gmra.mrb[12].mxu1 %vm481_vm2, %v400_v42  ;;  %v1790_v36 = vsel %vm1692_vm3, %v1780_v55, %v5502_v15  ;;  %v439_v38 = vrot.slane %v437_v27, 1  ;;  %v445_v18 = vshll.u32 %v5510_v32, 16  ;;  %v2143_v45 = vrot.slane %v5351_v28, 2  ;;  %v5561_v27 = vld [vmem:[%s5312_s27 + $0x90] ss:$0 sps:$4 sm:$0x11]  }
  0x35   : > { %4537 = vmatprep.mubr.msk.bf16.mxu1 %vm481_vm2, %v408_v50  ;;  %v435_v37 = vor.u32 %v433_v26, %v431_v31  ;;  %v2142_v42 = vsel %vm2139_vm4, %v2140_v13, %v2141_v30  ;;  %v432_v43 = vsel %vm332_vm1, %v427_v6, %v431_v31  ;;  %v441_v46 = vshrl.u32 %v5493_v11, 16 }
  0x36   : > { %v449_v50 = vshrl.u32 %v5510_v32, 16  ;;  %v453_v52 = vshll.u32 %v5516_v40, 16  ;;  %v2145_v53 = vrot.slane %v5357_v34, 2  ;;  %v447_v55 = vrot.slane %v445_v18, 1  ;;  %v5544_v34 = vld [vmem:[%s6250_s1 + $0xe] sm:$0x3] }
  0x37   : > { %4686 = vmatmul.mubr.msk.bf16.gmra.mrb[12].mxu0 %vm481_vm2, %v1772_v4  ;;  %v440_v47 = vsel %vm332_vm1, %v435_v37, %v439_v38  ;;  %v2671_v28 = vsel %vm536_vm0, %v5397_v1, 0  ;;  %v443_v57 = vor.u32 %v441_v46, %v439_v38  ;;  %v2144_v60 = vsel %vm2139_vm4, %v2141_v30, %v2143_v45  ;;  %v5538_v4 = vld [vmem:[%s5312_s27 + $0x88] sm:$0xff]  }
  0x38   : > { %4689 = vmatprep.mubr.msk.bf16.mxu0 %vm481_vm2, %v1781_v12  ;;  %v451_v61 = vor.u32 %v449_v50, %v447_v55  ;;  %v455_v3 = vrot.slane %v453_v52, 1  ;;  %v2146_v5 = vsel %vm2139_vm4, %v2143_v45, %v2145_v53  ;;  %v461_v7 = vshll.u32 %v5531_v56, 16 }
  0x39   : > { %v448_v1 = vsel %vm332_vm1, %v443_v57, %v447_v55  ;;  %v2147_v12 = vrot.slane %v5375_v49, 2  ;;  %v457_v16 = vshrl.u32 %v5516_v40, 16  ;;  %v469_v22 = vshll.u32 %v5538_v4, 16  ;;  %v5588_v55 = vld [vmem:[%s5312_s27 + $0x60] sm:$0xff]   ;;  %v5607_v57 = vld [vmem:[%s5312_s27 + $0x68] sm:$0xff]  }
  0x3a   : > { %v456_v17 = vsel %vm332_vm1, %v451_v61, %v455_v3  ;;  %v463_v26 = vrot.slane %v461_v7, 1  ;;  %v477_v37 = vshll.u32 %v5561_v27, 16  ;;  %v2151_v38 = vrot.slane %v5411_v23, 2  ;;  %v5625_v7 = vld [vmem:[%s5312_s27 + $0x78] sm:$0xff]  }
  0x3b   : > { %v459_v49 = vor.u32 %v457_v16, %v455_v3  ;;  %v2148_v13 = vsel %vm2139_vm4, %v2145_v53, %v2147_v12  ;;  %v471_v31 = vrot.slane %v469_v22, 1  ;;  %v2153_v18 = vrot.slane %v5431_v44, 2  ;;  %v5641_v22 = vld [vmem:[%s5312_s27 + $0x88] sm:$0xff]  }
  0x3c   : > { %4538 = vmatmul.mubr.msk.bf16.gmra.mrb[16].mxu1 %vm481_vm2, %v416_v21  ;;  %v465_v21 = vshrl.u32 %v5531_v56, 16  ;;  %v479_v45 = vrot.slane %v477_v37, 1  ;;  %v2155_v23 = vrot.slane %v5444_v62, 2  ;;  %v2157_v44 = vrot.slane %v5456_v14, 2 }
  0x3d   : > { %4541 = vmatprep.mubr.msk.bf16.mxu1 %vm481_vm2, %v424_v24  ;;  %v2149_v24 = vrot.slane %v5387_v59, 2  ;;  %v464_v59 = vsel %vm332_vm1, %v459_v49, %v463_v26  ;;  %v2159_v62 = vrot.slane %v5469_v29, 2  ;;  %v1032_v14 = vsel %vm536_vm0, %v5363_v39, 0 }
  0x3e   : > { %v467_v30 = vor.u32 %v465_v21, %v463_v26  ;;  %v2156_v52 = vsel %vm2139_vm4, %v2153_v18, %v2155_v23  ;;  %v2158_v53 = vsel %vm2139_vm4, %v2155_v23, %v2157_v44  ;;  %v2163_v61 = vrot.slane %v5607_v57, 2  ;;  %v5645_v26 = vld [vmem:[%s5312_s27 + $0x90] sm:$0xff]  }
  0x3f   : > { %4690 = vmatmul.mubr.msk.bf16.gmra.mrb[16].mxu0 %vm481_vm2, %v1790_v36  ;;  %v2150_v6 = vsel %vm2139_vm4, %v2147_v12, %v2149_v24  ;;  %v473_v36 = vshrl.u32 %v5538_v4, 16  ;;  %v2152_v46 = vsel %vm2139_vm4, %v2149_v24, %v2151_v38  ;;  %v2160_v29 = vsel %vm2139_vm4, %v2157_v44, %v2159_v62  ;;  %v5629_v12 = vld [vmem:[%s5312_s27 + $0x80] sm:$0xff]  }
  0x40   : > { %4711 = vmatprep.mubr.msk.bf16.mxu0 %vm481_vm2, %v2142_v42  ;;  %v472_v42 = vsel %vm332_vm1, %v467_v30, %v471_v31  ;;  %v2167_v16 = vrot.slane %v5625_v7, 2  ;;  %v2171_v49 = vrot.slane %v5641_v22, 2  ;;  %v2447_v30 = vld [vmem:[%s5312_s27 + $0x10] sm:$0xc] }
  0x44   : > { %4542 = vmatmul.mubr.msk.bf16.gmra.mrb[20].mxu1 %vm481_vm2, %v432_v43  ;;  %v475_v43 = vor.u32 %v473_v36, %v471_v31  ;;  %v5655_v31 = vld [vmem:[%s5312_s27 + $0x14] sm:$0xf] }
  0x45   : > { %4545 = vmatprep.mubr.msk.bf16.mxu1 %vm481_vm2, %v440_v47  ;;  %v2154_v47 = vsel %vm2139_vm4, %v2151_v38, %v2153_v18  ;;  %v5665_v37 = vcombine.low %v2447_v30, %v5655_v31  ;;  %v5668_v38 = vld [vmem:[%s5312_s27 + $0x18] sm:$0xff]  }
  0x46   : > { %v480_v50 = vsel %vm332_vm1, %v475_v43, %v479_v45  ;;  %v2580_v43 = vrot.slane %v5668_v38, 2 }
  0x47   : > { %4712 = vmatmul.mubr.msk.bf16.vlgmr.msra.gmra.mrb[0].mxu0 %vm481_vm2, %v2144_v60  ;;  %v5613_v60 = vld [vmem:[%s5312_s27 + $0x70] sm:$0xff]   ;;  %v2579_v18 = vrot.slane %v5665_v37, 2 }
  0x48   : > { %4748 = vmatpush3.bf16.msra.mxu0 %v2671_v28  ;;  %4715 = vmatprep.mubr.msk.bf16.mxu0 %vm481_vm2, %v2146_v5  ;;  %v2161_v28 = vrot.slane %v5588_v55, 2  ;;  %v2165_v3 = vrot.slane %v5613_v60, 2 }
  0x49   : > { %5159 = vmatprep.subr.msk.bf16.mxu0 %vm536_vm0, %v5544_v34 }
  0x4a   : > { %v2162_v39 = vsel %vm2139_vm4, %v2159_v62, %v2161_v28  ;;  %v2164_v5 = vsel %vm2139_vm4, %v2161_v28, %v2163_v61  ;;  %v2168_v21 = vsel %vm2139_vm4, %v2165_v3, %v2167_v16  ;;  %v3118_v62 = vsel %vm536_vm0, %v5544_v34, 0  ;;  %v5703_v28 = vld [vmem:[%s5312_s27 + $0x38] sm:$0xff]  }
  0x4c   : > { %4546 = vmatmul.mubr.msk.bf16.gmra.mrb[24].mxu1 %vm481_vm2, %v448_v1  ;;  %v2166_v1 = vsel %vm2139_vm4, %v2163_v61, %v2165_v3  ;;  %v2588_v61 = vrot.slane %v5703_v28, 2  ;;  %v5722_v3 = vld [vmem:[%s5312_s27 + $0x40] sm:$0xff]  }
  0x4d   : > { %4549 = vmatprep.mubr.msk.bf16.mxu1 %vm481_vm2, %v456_v17  ;;  %v2169_v17 = vrot.slane %v5629_v12, 2 }
  0x4f   : > { %4716 = vmatmul.mubr.msk.bf16.gmra.mrb[4].mxu0 %vm481_vm2, %v2148_v13  ;;  %v2170_v24 = vsel %vm2139_vm4, %v2167_v16, %v2169_v17  ;;  %v2173_v13 = vrot.slane %v5645_v26, 2  ;;  %v933_v16 = vld [vmem:[%s5312_s27] sm:$0xe] }
  0x50   : > { %4719 = vmatprep.mubr.msk.bf16.mxu0 %vm481_vm2, %v2150_v6  ;;  %v2172_v6 = vsel %vm2139_vm4, %v2169_v17, %v2171_v49  ;;  %v2590_v17 = vrot.slane %v5722_v3, 2 }
  0x51   : > { %v2174_v36 = vsel %vm2139_vm4, %v2171_v49, %v2173_v13 }
  0x52   : > { %v2591_v49 = vsel %vm2139_vm4, %v2588_v61, %v2590_v17 }
  0x54   : > { %4550 = vmatmul.mubr.msk.bf16.gmra.mrb[28].mxu1 %vm481_vm2, %v464_v59  ;;  %v5661_v59 = vld [vmem:[%s5312_s27 + $0x98] ss:$0 sps:$4 sm:$0x33]  }
  0x55   : > { %4553 = vmatprep.mubr.msk.bf16.mxu1 %vm481_vm2, %v472_v42  ;;  %v2175_v42 = vrot.slane %v5661_v59, 2 }
  0x57   : > { %4720 = vmatmul.mubr.msk.bf16.gmra.mrb[8].mxu0 %vm481_vm2, %v2152_v46  ;;  %v2176_v45 = vsel %vm2139_vm4, %v2173_v13, %v2175_v42  ;;  %v5681_v46 = vld [vmem:[%s5312_s27 + $0x20] sm:$0xff]   ;;  %v5740_v13 = vld [vmem:[%s5312_s27 + $0x50] sm:$0xff]  }
  0x58   : > { %4723 = vmatprep.mubr.msk.bf16.mxu0 %vm481_vm2, %v2154_v47  ;;  %v2581_v47 = vsel %vm2139_vm4, %v2579_v18, %v2580_v43  ;;  %v2582_v23 = vrot.slane %v5681_v46, 2  ;;  %v2594_v42 = vrot.slane %v5740_v13, 2 }
  0x5c   : > { %4554 = vmatmul.mubr.msk.bf16.gmra.mrb[32].mxu1 %vm481_vm2, %v480_v50  ;;  %v5685_v50 = vld [vmem:[%s5312_s27 + $0x28] sm:$0xff]  }
  0x5d   : > { %4559 = vmatprep.mubr.msk.bf16.mxu1 %vm481_vm2, %v5322_v9  ;;  %v5599_v9 = vld [vmem:[%s6250_s1 + $0x6] sm:$0x3]  ;;  %v2584_v44 = vrot.slane %v5685_v50, 2 }
  0x5f   : > { %4724 = vmatmul.mubr.msk.bf16.gmra.mrb[12].mxu0 %vm481_vm2, %v2156_v52  ;;  %v2583_v52 = vsel %vm2139_vm4, %v2580_v43, %v2582_v23 }
  0x60   : > { %4727 = vmatprep.mubr.msk.bf16.mxu0 %vm481_vm2, %v2158_v53  ;;  %v5697_v53 = vld [vmem:[%s5312_s27 + $0x30] sm:$0xff]  }
  0x64   : > { %4560 = vmatmul.mubr.msk.bf16.vlgmr.msra.gmra.mrb[0].mxu1 %vm481_vm2, %v5325_v10 }
  0x65   : > { %4563 = vmatprep.mubr.msk.bf16.mxu1 %vm481_vm2, %v5340_v19  ;;  %4596 = vmatpush3.bf16.msra.mxu1 %v1032_v14  ;;  %v2585_v14 = vsel %vm2139_vm4, %v2582_v23, %v2584_v44  ;;  %v945_v23 = vrot.slane %v5354_v33, 1 }
  0x66   : > { %5154 = vmatprep.subr.msk.bf16.mxu1 %vm536_vm0, %v5599_v9 }
  0x67   : > { %4728 = vmatmul.mubr.msk.bf16.gmra.mrb[16].mxu0 %vm481_vm2, %v2160_v29  ;;  %v5708_v29 = vld [vmem:[%s6250_s1 + $0x10] sm:$0x3] }
  0x68   : > { %4731 = vmatprep.mubr.msk.bf16.mxu0 %vm481_vm2, %v2162_v39  ;;  %v2586_v39 = vrot.slane %v5697_v53, 2 }
  0x6a   : > { %v2587_v34 = vsel %vm2139_vm4, %v2584_v44, %v2586_v39 }
  0x6c   : > { %4564 = vmatmul.mubr.msk.bf16.gmra.mrb[4].mxu1 %vm481_vm2, %v5354_v33 }
  0x6d   : > { %4567 = vmatprep.mubr.msk.bf16.mxu1 %vm481_vm2, %v5372_v48 }
  0x6f   : > { %4732 = vmatmul.mubr.msk.bf16.gmra.mrb[20].mxu0 %vm481_vm2, %v2164_v5  ;;  %v2589_v5 = vsel %vm2139_vm4, %v2586_v39, %v2588_v61  ;;  %v1471_v39 = vsel %vm536_vm0, %v5599_v9, 0  ;;  %v947_v61 = vrot.slane %v5372_v48, 1  ;;  %v5233_v9 = vld [vmem:[%s6250_s1 + $0x8] sm:$0x3] }
  0x70   : > { %4735 = vmatprep.mubr.msk.bf16.mxu0 %vm481_vm2, %v2166_v1  ;;  %v5726_v1 = vld [vmem:[%s5312_s27 + $0x48] sm:$0xff]  }
  0x71   : > { %v948_v48 = vsel %vm939_vm5, %v945_v23, %v947_v61 }
  0x74   : > { %4568 = vmatmul.mubr.msk.bf16.gmra.mrb[8].mxu1 %vm481_vm2, %v5381_v54 }
  0x75   : > { %4571 = vmatprep.mubr.msk.bf16.mxu1 %vm481_vm2, %v5392_v0 }
  0x77   : > { %4736 = vmatmul.mubr.msk.bf16.gmra.mrb[24].mxu0 %vm481_vm2, %v2168_v21  ;;  %v4098_v21 = vcombine.low %v933_v16, %v5319_v8  ;;  %v5745_v8 = vld [vmem:[%s5312_s27 + $0x58] sm:$0xff]   ;;  %v949_v16 = vrot.slane %v5381_v54, 1 }
  0x78   : > { %4739 = vmatprep.mubr.msk.bf16.mxu0 %vm481_vm2, %v2170_v24  ;;  %v2592_v24 = vrot.slane %v5726_v1, 2  ;;  %v2596_v43 = vrot.slane %v5745_v8, 2 }
  0x79   : > { %v940_v30 = vrot.slane %v4098_v21, 1  ;;  %v5787_v21 = vld [vmem:[%s5312_s27 + $0x78] sm:$0xff]   ;;  %v950_v54 = vsel %vm939_vm5, %v947_v61, %v949_v16 }
  0x7a   : > { %v2597_v44 = vsel %vm2139_vm4, %v2594_v42, %v2596_v43 }
  0x7c   : > { %4572 = vmatmul.mubr.msk.bf16.gmra.mrb[12].mxu1 %vm481_vm2, %v5420_v35 }
  0x7d   : > { %4575 = vmatprep.mubr.msk.bf16.mxu1 %vm481_vm2, %v5436_v51 }
  0x7f   : > { %4740 = vmatmul.mubr.msk.bf16.gmra.mrb[28].mxu0 %vm481_vm2, %v2172_v6  ;;  %v941_v6 = vrot.slane %v5325_v10, 1  ;;  %v943_v10 = vrot.slane %v5340_v19, 1 }
  0x80   : > { %4743 = vmatprep.mubr.msk.bf16.mxu0 %vm481_vm2, %v2174_v36  ;;  %v2593_v36 = vsel %vm2139_vm4, %v2590_v17, %v2592_v24 }
  0x81   : > { %v942_v18 = vsel %vm939_vm5, %v940_v30, %v941_v6  ;;  %v951_v30 = vrot.slane %v5392_v0, 1 }
  0x84   : > { %4576 = vmatmul.mubr.msk.bf16.gmra.mrb[16].mxu1 %vm481_vm2, %v5447_v63 }
  0x85   : > { %4579 = vmatprep.mubr.msk.bf16.mxu1 %vm481_vm2, %v5464_v25 }
  0x87   : > { %4744 = vmatmul.mubr.msk.bf16.gmra.mrb[32].mxu0 %vm481_vm2, %v2176_v45  ;;  %v2595_v45 = vsel %vm2139_vm4, %v2592_v24, %v2594_v42  ;;  %v953_v42 = vrot.slane %v5420_v35, 1  ;;  %v955_v35 = vrot.slane %v5436_v51, 1 }
  0x88   : > { %4749 = vmatprep.mubr.msk.bf16.mxu0 %vm481_vm2, %v2581_v47  ;;  %v5758_v47 = vld [vmem:[%s5312_s27 + $0x60] sm:$0xff]  }
  0x89   : > { %v2598_v19 = vrot.slane %v5758_v47, 2 }
  0x8c   : > { %4580 = vmatmul.mubr.msk.bf16.gmra.mrb[20].mxu1 %vm481_vm2, %v5474_v41 }
  0x8d   : > { %4583 = vmatprep.mubr.msk.bf16.mxu1 %vm481_vm2, %v5488_v58 }
  0x8f   : > { %4750 = vmatmul.mubr.msk.bf16.vlgmr.msra.gmra.mrb[0].mxu0 %vm481_vm2, %v2583_v52  ;;  %v5763_v52 = vld [vmem:[%s5312_s27 + $0x68] sm:$0xff]  }
  0x90   : > { %4786 = vmatpush3.bf16.msra.mxu0 %v3118_v62  ;;  %4753 = vmatprep.mubr.msk.bf16.mxu0 %vm481_vm2, %v2585_v14  ;;  %v944_v62 = vsel %vm939_vm5, %v941_v6, %v943_v10  ;;  %v946_v14 = vsel %vm939_vm5, %v943_v10, %v945_v23  ;;  %v2600_v33 = vrot.slane %v5763_v52, 2  ;;  %v952_v10 = vsel %vm939_vm5, %v949_v16, %v951_v30 }
  0x91   : > { %5160 = vmatprep.subr.msk.bf16.mxu0 %vm536_vm0, %v5708_v29  ;;  %v2894_v16 = vshrl.u32 %v5665_v37, 16 }
  0x92   : > { %v2601_v17 = vsel %vm2139_vm4, %v2598_v19, %v2600_v33 }
  0x94   : > { %4584 = vmatmul.mubr.msk.bf16.gmra.mrb[24].mxu1 %vm481_vm2, %v5493_v11 }
  0x95   : > { %4587 = vmatprep.mubr.msk.bf16.mxu1 %vm481_vm2, %v5510_v32 }
  0x97   : > { %4754 = vmatmul.mubr.msk.bf16.gmra.mrb[4].mxu0 %vm481_vm2, %v2587_v34  ;;  %v2599_v34 = vsel %vm2139_vm4, %v2596_v43, %v2598_v19  ;;  %v5805_v43 = vld [vmem:[%s5312_s27 + $0x88] sm:$0xff]   ;;  %v957_v19 = vrot.slane %v5447_v63, 1  ;;  %v2897_v63 = vshll.u32 %v5665_v37, 16 }
  0x98   : > { %4757 = vmatprep.mubr.msk.bf16.mxu0 %vm481_vm2, %v2589_v5  ;;  %v5778_v5 = vld [vmem:[%s5312_s27 + $0x70] sm:$0xff]   ;;  %v2608_v23 = vrot.slane %v5805_v43, 2 }
  0x99   : > { %v2602_v24 = vrot.slane %v5778_v5, 2  ;;  %v958_v51 = vsel %vm939_vm5, %v955_v35, %v957_v19 }
  0x9b   : > { %v2603_v6 = vsel %vm2139_vm4, %v2600_v33, %v2602_v24  ;;  %v956_v33 = vsel %vm939_vm5, %v953_v42, %v955_v35 }
  0x9c   : > { %4588 = vmatmul.mubr.msk.bf16.gmra.mrb[28].mxu1 %vm481_vm2, %v5516_v40 }
  0x9d   : > { %4591 = vmatprep.mubr.msk.bf16.mxu1 %vm481_vm2, %v5531_v56 }
  0x9f   : > { %4758 = vmatmul.mubr.msk.bf16.gmra.mrb[8].mxu0 %vm481_vm2, %v2591_v49  ;;  %v2604_v49 = vrot.slane %v5787_v21, 2 }
  0xa0   : > { %4761 = vmatprep.mubr.msk.bf16.mxu0 %vm481_vm2, %v2593_v36  ;;  %v5800_v36 = vld [vmem:[%s5312_s27 + $0x80] sm:$0xff]  }
  0xa1   : > { %v2606_v0 = vrot.slane %v5800_v36, 2 }
  0xa4   : > { %4592 = vmatmul.mubr.msk.bf16.gmra.mrb[32].mxu1 %vm481_vm2, %v5538_v4 }
  0xa5   : > { %4597 = vmatprep.mubr.msk.bf16.mxu1 %vm481_vm2, %v942_v18  ;;  %v2605_v18 = vsel %vm2139_vm4, %v2602_v24, %v2604_v49 }
  0xa7   : > { %4762 = vmatmul.mubr.msk.bf16.gmra.mrb[12].mxu0 %vm481_vm2, %v2595_v45  ;;  %v954_v45 = vsel %vm939_vm5, %v951_v30, %v953_v42  ;;  %v961_v30 = vrot.slane %v5474_v41, 1  ;;  %v2899_v42 = vrot.slane %v2897_v63, 3  ;;  %v2920_v41 = vshrl.u32 %v5685_v50, 16 }
  0xa8   : > { %4765 = vmatprep.mubr.msk.bf16.mxu0 %vm481_vm2, %v2597_v44  ;;  %v2607_v44 = vsel %vm2139_vm4, %v2604_v49, %v2606_v0  ;;  %v5229_v49 = vld [vmem:[%s5312_s27 + $0xa0] ss:$0 sps:$4 sm:$0x33]  }
  0xac   : > { %4598 = vmatmul.mubr.msk.bf16.vlgmr.msra.gmra.mrb[0].mxu1 %vm481_vm2, %v944_v62  ;;  %v5818_v62 = vld [vmem:[%s5312_s27 + $0x90] sm:$0xff]  }
  0xad   : > { %4601 = vmatprep.mubr.msk.bf16.mxu1 %vm481_vm2, %v946_v14  ;;  %4634 = vmatpush3.bf16.msra.mxu1 %v1471_v39  ;;  %v5822_v14 = vld [vmem:[%s5312_s27 + $0x98] sm:$0xff]   ;;  %v2609_v39 = vsel %vm2139_vm4, %v2606_v0, %v2608_v23  ;;  %v2610_v61 = vrot.slane %v5818_v62, 2  ;;  %v2614_v0 = vrot.slane %v5229_v49, 2 }
  0xae   : > { %5156 = vmatprep.subr.msk.bf16.mxu1 %vm536_vm0, %v5233_v9  ;;  %v2902_v9 = vshrl.u32 %v5668_v38, 16 }
  0xaf   : > { %4766 = vmatmul.mubr.msk.bf16.gmra.mrb[16].mxu0 %vm481_vm2, %v2599_v34  ;;  %v2612_v34 = vrot.slane %v5822_v14, 2  ;;  %v2611_v24 = vsel %vm2139_vm4, %v2608_v23, %v2610_v61  ;;  %v2914_v23 = vshll.u32 %v5681_v46, 16 }
  0xb0   : > { %4769 = vmatprep.mubr.msk.bf16.mxu0 %vm481_vm2, %v2601_v17  ;;  %v2905_v17 = vshll.u32 %v5668_v38, 16  ;;  %v2904_v37 = vrot.slane %v2902_v9, 2  ;;  %v2922_v9 = vrot.slane %v2920_v41, 2  ;;  %v2947_v41 = vshrl.u32 %v5722_v3, 16 }
  0xb4   : > { %4602 = vmatmul.mubr.msk.bf16.gmra.mrb[4].mxu1 %vm481_vm2, %v948_v48  ;;  %v959_v48 = vrot.slane %v5464_v25, 1 }
  0xb5   : > { %4605 = vmatprep.mubr.msk.bf16.mxu1 %vm481_vm2, %v950_v54  ;;  %v2613_v54 = vsel %vm2139_vm4, %v2610_v61, %v2612_v34 }
  0xb6   : > { %v962_v25 = vsel %vm939_vm5, %v959_v48, %v961_v30 }
  0xb7   : > { %4770 = vmatmul.mubr.msk.bf16.gmra.mrb[20].mxu0 %vm481_vm2, %v2603_v6  ;;  %v2896_v6 = vrot.slane %v2894_v16, 2  ;;  %v965_v16 = vrot.slane %v5493_v11, 1  ;;  %v2938_v11 = vshrl.u32 %v5703_v28, 16 }
  0xb8   : > { %4773 = vmatprep.mubr.msk.bf16.mxu0 %vm481_vm2, %v2605_v18  ;;  %v2907_v18 = vrot.slane %v2905_v17, 3 }
  0xb9   : > { %v2900_v35 = vor.u32 %v2899_v42, %v2896_v6  ;;  %v2941_v6 = vshll.u32 %v5703_v28, 16 }
  0xbc   : > { %4606 = vmatmul.mubr.msk.bf16.gmra.mrb[8].mxu1 %vm481_vm2, %v952_v10  ;;  %v960_v10 = vsel %vm939_vm5, %v957_v19, %v959_v48  ;;  %v963_v19 = vrot.slane %v5488_v58, 1  ;;  %v2929_v58 = vshrl.u32 %v5697_v53, 16 }
  0xbd   : > { %4609 = vmatprep.mubr.msk.bf16.mxu1 %vm481_vm2, %v954_v45  ;;  %v2911_v45 = vshrl.u32 %v5681_v46, 16 }
  0xbe   : > { %v964_v48 = vsel %vm939_vm5, %v961_v30, %v963_v19  ;;  %v967_v30 = vrot.slane %v5510_v32, 1  ;;  %v2950_v32 = vshll.u32 %v5722_v3, 16 }
  0xbf   : > { %4774 = vmatmul.mubr.msk.bf16.gmra.mrb[24].mxu0 %vm481_vm2, %v2607_v44  ;;  %v2908_v44 = vor.u32 %v2907_v18, %v2904_v37  ;;  %v2913_v61 = vrot.slane %v2911_v45, 2  ;;  %v2931_v37 = vrot.slane %v2929_v58, 2  ;;  %v2940_v45 = vrot.slane %v2938_v11, 2 }
  0xc0   : > { %4777 = vmatprep.mubr.msk.bf16.mxu0 %vm481_vm2, %v2609_v39  ;;  %v2923_v39 = vshll.u32 %v5685_v50, 16  ;;  %v2965_v58 = vshrl.u32 %v5740_v13, 16  ;;  %v2977_v11 = vshll.u32 %v5745_v8, 16 }
  0xc1   : > { %v2909_v63 = vsel %vm2892_vm6, %v2900_v35, %v2908_v44  ;;  %v968_v35 = vsel %vm939_vm5, %v965_v16, %v967_v30 }
  0xc2   : > { %v2925_v17 = vrot.slane %v2923_v39, 3 }
  0xc4   : > { %4610 = vmatmul.mubr.msk.bf16.gmra.mrb[12].mxu1 %vm481_vm2, %v956_v33  ;;  %v2615_v33 = vsel %vm2139_vm4, %v2612_v34, %v2614_v0  ;;  %v2932_v34 = vshll.u32 %v5697_v53, 16  ;;  %v2926_v49 = vor.u32 %v2925_v17, %v2922_v9  ;;  %v3432_v0 = vsel %vm536_vm0, %v5708_v29, 0 }
  0xc5   : > { %4613 = vmatprep.mubr.msk.bf16.mxu1 %vm481_vm2, %v958_v51  ;;  %v2916_v51 = vrot.slane %v2914_v23, 3  ;;  %v2943_v23 = vrot.slane %v2941_v6, 3  ;;  %v2956_v29 = vshrl.u32 %v5726_v1, 16 }
  0xc6   : > { %v2934_v18 = vrot.slane %v2932_v34, 3  ;;  %v2968_v34 = vshll.u32 %v5740_v13, 16 }
  0xc7   : > { %4778 = vmatmul.mubr.msk.bf16.gmra.mrb[28].mxu0 %vm481_vm2, %v2611_v24  ;;  %v2917_v24 = vor.u32 %v2916_v51, %v2913_v61  ;;  %v2944_v39 = vor.u32 %v2943_v23, %v2940_v45  ;;  %v2949_v61 = vrot.slane %v2947_v41, 2  ;;  %v2952_v51 = vrot.slane %v2950_v32, 3 }
  0xc8   : > { %4781 = vmatprep.mubr.msk.bf16.mxu0 %vm481_vm2, %v2613_v54  ;;  %v966_v54 = vsel %vm939_vm5, %v963_v19, %v965_v16  ;;  %v2959_v19 = vshll.u32 %v5726_v1, 16  ;;  %v2958_v17 = vrot.slane %v2956_v29, 2  ;;  %v2979_v23 = vrot.slane %v2977_v11, 3  ;;  %v5235_v29 = vld [vmem:[%s5312_s27 + $0x18] sm:$0xff]  }
  0xc9   : > { %v2918_v42 = vsel %vm2892_vm6, %v2908_v44, %v2917_v24  ;;  %v2935_v44 = vor.u32 %v2934_v18, %v2931_v37  ;;  %v2970_v37 = vrot.slane %v2968_v34, 3  ;;  %v1379_v18 = vrot.slane %v5343_v20, 1 }
  0xca   : > { %v2983_v32 = vshrl.u32 %v5758_v47, 16  ;;  %v2986_v20 = vshll.u32 %v5758_v47, 16  ;;  %v3004_v34 = vshll.u32 %v5778_v5, 16  ;;  %v3013_v11 = vshll.u32 %v5787_v21, 16 }
  0xcb   : > { %v2936_v16 = vsel %vm2892_vm6, %v2926_v49, %v2935_v44  ;;  %v2945_v9 = vsel %vm2892_vm6, %v2935_v44, %v2944_v39 }
  0xcc   : > { %4614 = vmatmul.mubr.msk.bf16.gmra.mrb[16].mxu1 %vm481_vm2, %v960_v10  ;;  %v969_v10 = vrot.slane %v5516_v40, 1 }
  0xcd   : > { %4617 = vmatprep.mubr.msk.bf16.mxu1 %vm481_vm2, %v962_v25  ;;  %v2927_v25 = vsel %vm2892_vm6, %v2917_v24, %v2926_v49 }
  0xce   : > { %v970_v40 = vsel %vm939_vm5, %v967_v30, %v969_v10  ;;  %v975_v30 = vrot.slane %v5561_v27, 1 }
  0xcf   : > { %4782 = vmatmul.mubr.msk.bf16.gmra.mrb[32].mxu0 %vm481_vm2, %v2615_v33  ;;  %v971_v33 = vrot.slane %v5531_v56, 1 }
  0xd0   : > { %4787 = vmatprep.mubr.msk.bf16.mxu0 %vm481_vm2, %v2909_v63  ;;  %v973_v63 = vrot.slane %v5538_v4, 1  ;;  %v2974_v4 = vshrl.u32 %v5745_v8, 16 }
  0xd1   : > { %v972_v24 = vsel %vm939_vm5, %v969_v10, %v971_v33  ;;  %v5234_v10 = vld [vmem:[%s5312_s27 + $0x10] sm:$0xff]  }
  0xd2   : > { %v974_v56 = vsel %vm939_vm5, %v971_v33, %v973_v63  ;;  %v2976_v45 = vrot.slane %v2974_v4, 2  ;;  %v3010_v4 = vshrl.u32 %v5787_v21, 16 }
  0xd4   : > { %4618 = vmatmul.mubr.msk.bf16.gmra.mrb[20].mxu1 %vm481_vm2, %v964_v48  ;;  %v2961_v48 = vrot.slane %v2959_v19, 3  ;;  %v2980_v44 = vor.u32 %v2979_v23, %v2976_v45  ;;  %v1382_v19 = vrot.slane %v5235_v29, 1  ;;  %v3012_v45 = vrot.slane %v3010_v4, 2 }
  0xd5   : > { %4621 = vmatprep.mubr.msk.bf16.mxu1 %vm481_vm2, %v966_v54  ;;  %v2953_v54 = vor.u32 %v2952_v51, %v2949_v61  ;;  %v2985_v61 = vrot.slane %v2983_v32, 2  ;;  %v2988_v51 = vrot.slane %v2986_v20, 3  ;;  %v3015_v23 = vrot.slane %v3013_v11, 3  ;;  %v5241_v11 = vld [vmem:[%s5312_s27 + $0x48] sm:$0xff]  }
  0xd6   : > { %v2962_v49 = vor.u32 %v2961_v48, %v2958_v17  ;;  %v3022_v32 = vshll.u32 %v5800_v36, 16  ;;  %v3049_v4 = vshll.u32 %v5822_v14, 16 }
  0xd7   : > { %4788 = vmatmul.mubr.msk.bf16.vlgmr.msra.gmra.mrb[0].mxu0 %vm481_vm2, %v2918_v42  ;;  %v2954_v6 = vsel %vm2892_vm6, %v2944_v39, %v2953_v54  ;;  %v2967_v42 = vrot.slane %v2965_v58, 2  ;;  %v2995_v39 = vshll.u32 %v5763_v52, 16  ;;  %v3001_v58 = vshrl.u32 %v5778_v5, 16 }
  0xd8   : > { %4824 = vmatpush3.bf16.msra.mxu0 %v3432_v0  ;;  %4791 = vmatprep.mubr.msk.bf16.mxu0 %vm481_vm2, %v2927_v25  ;;  %v1380_v0 = vrot.slane %v5234_v10, 1  ;;  %v2963_v25 = vsel %vm2892_vm6, %v2953_v54, %v2962_v49  ;;  %v2989_v54 = vor.u32 %v2988_v51, %v2985_v61  ;;  %v5238_v10 = vld [vmem:[%s5312_s27 + $0x30] sm:$0xff]   ;;  %v3016_v20 = vor.u32 %v3015_v23, %v3012_v45  ;;  %v5240_v51 = vld [vmem:[%s5312_s27 + $0x40] sm:$0xff]  }
  0xd9   : > { %v2971_v41 = vor.u32 %v2970_v37, %v2967_v42  ;;  %v2997_v48 = vrot.slane %v2995_v39, 3  ;;  %v3003_v37 = vrot.slane %v3001_v58, 2  ;;  %v5239_v39 = vld [vmem:[%s5312_s27 + $0x38] sm:$0xff]   ;;  %v3024_v61 = vrot.slane %v3022_v32, 3 }
  0xda   : > { %v1381_v27 = vsel %vm939_vm5, %v1379_v18, %v1380_v0  ;;  %v2990_v42 = vsel %vm2892_vm6, %v2980_v44, %v2989_v54  ;;  %v3006_v18 = vrot.slane %v3004_v34, 3  ;;  %v1390_v29 = vrot.slane %v5239_v39, 1 }
  0xdb   : > { %v2972_v33 = vsel %vm2892_vm6, %v2962_v49, %v2971_v41  ;;  %v3040_v58 = vshll.u32 %v5818_v62, 16  ;;  %v3051_v23 = vrot.slane %v3049_v4, 3  ;;  %v3345_v4 = vrot.slane %v5685_v50, 3 }
  0xdc   : > { %4622 = vmatmul.mubr.msk.bf16.gmra.mrb[24].mxu1 %vm481_vm2, %v968_v35  ;;  %v976_v35 = vsel %vm939_vm5, %v973_v63, %v975_v30  ;;  %v3347_v50 = vrot.slane %v5697_v53, 3 }
  0xdd   : > { %4625 = vmatprep.mubr.msk.bf16.mxu1 %vm481_vm2, %v970_v40  ;;  %v2992_v40 = vshrl.u32 %v5763_v52, 16 }
  0xdf   : > { %4792 = vmatmul.mubr.msk.bf16.gmra.mrb[4].mxu0 %vm481_vm2, %v2936_v16  ;;  %v5236_v16 = vld [vmem:[%s5312_s27 + $0x20] sm:$0xff]   ;;  %v2994_v17 = vrot.slane %v2992_v40, 2  ;;  %v3031_v40 = vshll.u32 %v5805_v43, 16 }
  0xe0   : > { %4795 = vmatprep.mubr.msk.bf16.mxu0 %vm481_vm2, %v2945_v9  ;;  %v1384_v63 = vrot.slane %v5236_v16, 1  ;;  %v2981_v9 = vsel %vm2892_vm6, %v2971_v41, %v2980_v44  ;;  %v3007_v41 = vor.u32 %v3006_v18, %v3003_v37  ;;  %v3028_v44 = vshrl.u32 %v5805_v43, 16  ;;  %v5242_v18 = vld [vmem:[%s5312_s27 + $0x50] sm:$0xff]  }
  0xe1   : > { %v2998_v49 = vor.u32 %v2997_v48, %v2994_v17  ;;  %v1392_v16 = vrot.slane %v5240_v51, 1  ;;  %v3033_v17 = vrot.slane %v3031_v40, 3  ;;  %v3042_v37 = vrot.slane %v3040_v58, 3  ;;  %v5243_v40 = vld [vmem:[%s5312_s27 + $0x58] sm:$0xff]  }
  0xe2   : > { %v1398_v39 = vrot.slane %v5243_v40, 1  ;;  %v1801_v40 = vshrl.u32 %v5607_v57, 16 }
  0xe4   : > { %4626 = vmatmul.mubr.msk.bf16.gmra.mrb[28].mxu1 %vm481_vm2, %v972_v24  ;;  %v1383_v24 = vsel %vm939_vm5, %v1380_v0, %v1382_v19  ;;  %v1388_v0 = vrot.slane %v5238_v10, 1  ;;  %v1396_v10 = vrot.slane %v5242_v18, 1  ;;  %v3349_v18 = vrot.slane %v5703_v28, 3 }
  0xe5   : > { %4629 = vmatprep.mubr.msk.bf16.mxu1 %vm481_vm2, %v974_v56  ;;  %v1385_v56 = vsel %vm939_vm5, %v1382_v19, %v1384_v63  ;;  %v3008_v19 = vsel %vm2892_vm6, %v2998_v49, %v3007_v41 }
  0xe6   : > { %v1391_v48 = vsel %vm939_vm5, %v1388_v0, %v1390_v29  ;;  %v3350_v53 = vsel %vm3339_vm7, %v3347_v50, %v3349_v18 }
  0xe7   : > { %4796 = vmatmul.mubr.msk.bf16.gmra.mrb[8].mxu0 %vm481_vm2, %v2954_v6  ;;  %v5237_v6 = vld [vmem:[%s5312_s27 + $0x28] sm:$0xff]  }
  0xe8   : > { %4799 = vmatprep.mubr.msk.bf16.mxu0 %vm481_vm2, %v2963_v25  ;;  %v1386_v30 = vrot.slane %v5237_v6, 1  ;;  %v2999_v25 = vsel %vm2892_vm6, %v2989_v54, %v2998_v49  ;;  %v1393_v54 = vsel %vm939_vm5, %v1390_v29, %v1392_v16  ;;  %v3046_v49 = vshrl.u32 %v5822_v14, 16 }
  0xe9   : > { %v1394_v6 = vrot.slane %v5241_v11, 1  ;;  %v1406_v11 = vrot.slane %v5625_v7, 1 }
  0xea   : > { %v3048_v45 = vrot.slane %v3046_v49, 2 }
  0xec   : > { %4630 = vmatmul.mubr.msk.bf16.gmra.mrb[32].mxu1 %vm481_vm2, %v976_v35  ;;  %v1387_v35 = vsel %vm939_vm5, %v1384_v63, %v1386_v30  ;;  %v3017_v63 = vsel %vm2892_vm6, %v3007_v41, %v3016_v20 }
  0xed   : > { %4635 = vmatprep.mubr.msk.bf16.mxu1 %vm481_vm2, %v1381_v27  ;;  %v3019_v27 = vshrl.u32 %v5800_v36, 16 }
  0xef   : > { %4800 = vmatmul.mubr.msk.bf16.gmra.mrb[12].mxu0 %vm481_vm2, %v2972_v33  ;;  %v3021_v33 = vrot.slane %v3019_v27, 2 }
  0xf0   : > { %4803 = vmatprep.mubr.msk.bf16.mxu0 %vm481_vm2, %v2981_v9  ;;  %v3030_v9 = vrot.slane %v3028_v44, 2  ;;  %v3333_v44 = vld [vmem:[%s5312_s27 + $0x10] sm:$0x8] }
  0xf2   : > { %v3034_v34 = vor.u32 %v3033_v17, %v3030_v9 }
  0xf4   : > { %4636 = vmatmul.mubr.msk.bf16.vlgmr.msra.gmra.mrb[0].mxu1 %vm481_vm2, %v1383_v24  ;;  %v3025_v24 = vor.u32 %v3024_v61, %v3021_v33  ;;  %v1400_v61 = vrot.slane %v5588_v55, 1 }
  0xf5   : > { %4639 = vmatprep.mubr.msk.bf16.mxu1 %vm481_vm2, %v1385_v56  ;;  %4862 = vmatpush3.bf16.msra.mxu1 %v5294_v2  ;;  %v1389_v2 = vsel %vm939_vm5, %v1386_v30, %v1388_v0  ;;  %v3037_v56 = vshrl.u32 %v5818_v62, 16  ;;  %v5958_v0 = vld [vmem:[%s5312_s27 + $0xa0] ss:$0 sps:$4 sm:$0x77]  }
  0xf6   : > { %v3026_v30 = vsel %vm2892_vm6, %v3016_v20, %v3025_v24  ;;  %v3055_v27 = vshrl.u32 %v5958_v0, 16  ;;  %v3058_v32 = vshll.u32 %v5958_v0, 16  ;;  %v3052_v20 = vor.u32 %v3051_v23, %v3048_v45 }
  0xf7   : > { %4804 = vmatmul.mubr.msk.bf16.gmra.mrb[16].mxu0 %vm481_vm2, %v2990_v42  ;;  %v3039_v42 = vrot.slane %v3037_v56, 2  ;;  %v1401_v17 = vsel %vm939_vm5, %v1398_v39, %v1400_v61  ;;  %v1404_v56 = vrot.slane %v5613_v60, 1  ;;  %v1412_v45 = vrot.slane %v5645_v26, 1 }
  0xf8   : > { %4807 = vmatprep.mubr.msk.bf16.mxu0 %vm481_vm2, %v2999_v25  ;;  %v3035_v25 = vsel %vm2892_vm6, %v3025_v24, %v3034_v34  ;;  %v3060_v33 = vrot.slane %v3058_v32, 3  ;;  %v3341_v24 = vrot.slane %v5668_v38, 3  ;;  %v3343_v38 = vrot.slane %v5681_v46, 3 }
  0xf9   : > { %v3043_v41 = vor.u32 %v3042_v37, %v3039_v42  ;;  %v1407_v46 = vsel %vm939_vm5, %v1404_v56, %v1406_v11  ;;  %v1792_v23 = vshrl.u32 %v5588_v55, 16 }
  0xfa   : > { %v3346_v42 = vsel %vm3339_vm7, %v3343_v38, %v3345_v4 }
  0xfb   : > { %v3044_v29 = vsel %vm2892_vm6, %v3034_v34, %v3043_v41  ;;  %v3053_v51 = vsel %vm2892_vm6, %v3043_v41, %v3052_v20  ;;  %v5232_v41 = vld [vmem:[%s5312_s27 + $0x98] ss:$0 sps:$4 sm:$0x11]   ;;  %v1794_v32 = vrot.slane %v1792_v23, 1 }
  0xfc   : > { %4640 = vmatmul.mubr.msk.bf16.gmra.mrb[4].mxu1 %vm481_vm2, %v1387_v35  ;;  %v1395_v35 = vsel %vm939_vm5, %v1392_v16, %v1394_v6  ;;  %v4254_v16 = vcombine.low %v3333_v44, %v5655_v31  ;;  %v3353_v44 = vrot.slane %v5726_v1, 3 }
  0xfd   : > { %4643 = vmatprep.mubr.msk.bf16.mxu1 %vm481_vm2, %v1389_v2  ;;  %v1397_v2 = vsel %vm939_vm5, %v1394_v6, %v1396_v10  ;;  %v3344_v6 = vsel %vm3339_vm7, %v3341_v24, %v3343_v38 }
  0xff   : > { %4808 = vmatmul.mubr.msk.bf16.gmra.mrb[20].mxu0 %vm481_vm2, %v3008_v19  ;;  %v3057_v19 = vrot.slane %v3055_v27, 2 }
 0x100   : > { %4811 = vmatprep.mubr.msk.bf16.mxu0 %vm481_vm2, %v3017_v63  ;;  %v1399_v63 = vsel %vm939_vm5, %v1396_v10, %v1398_v39  ;;  %v1410_v10 = vrot.slane %v5641_v22, 1  ;;  %v1804_v39 = vshll.u32 %v5607_v57, 16 }
 0x101   : > { %v3061_v9 = vor.u32 %v3060_v33, %v3057_v19  ;;  %v1813_v33 = vshll.u32 %v5613_v60, 16 }
 0x102   : > { %v1413_v27 = vsel %vm939_vm5, %v1410_v10, %v1412_v45 }
 0x103   : > { %v3062_v31 = vsel %vm2892_vm6, %v3052_v20, %v3061_v9 }
 0x104   : > { %4644 = vmatmul.mubr.msk.bf16.gmra.mrb[8].mxu1 %vm481_vm2, %v1391_v48  ;;  %v3340_v48 = vrot.slane %v4254_v16, 3  ;;  %v1806_v16 = vrot.slane %v1804_v39, 2 }
 0x105   : > { %4647 = vmatprep.mubr.msk.bf16.mxu1 %vm481_vm2, %v1393_v54  ;;  %v1402_v54 = vrot.slane %v5607_v57, 1 }
 0x106   : > { %v3342_v58 = vsel %vm3339_vm7, %v3340_v48, %v3341_v24  ;;  %v3357_v48 = vrot.slane %v5745_v8, 3  ;;  %v1819_v24 = vshrl.u32 %v5625_v7, 16 }
 0x107   : > { %4812 = vmatmul.mubr.msk.bf16.gmra.mrb[24].mxu0 %vm481_vm2, %v3026_v30  ;;  %v1403_v34 = vsel %vm939_vm5, %v1400_v61, %v1402_v54  ;;  %v1405_v49 = vsel %vm939_vm5, %v1402_v54, %v1404_v56  ;;  %v1408_v30 = vrot.slane %v5629_v12, 1  ;;  %v1822_v54 = vshll.u32 %v5625_v7, 16 }
 0x108   : > { %4815 = vmatprep.mubr.msk.bf16.mxu0 %vm481_vm2, %v3035_v25  ;;  %v3348_v25 = vsel %vm3339_vm7, %v3345_v4, %v3347_v50 }
 0x109   : > { %v1409_v37 = vsel %vm939_vm5, %v1406_v11, %v1408_v30  ;;  %v1411_v28 = vsel %vm939_vm5, %v1408_v30, %v1410_v10  ;;  %v1824_v38 = vrot.slane %v1822_v54, 2  ;;  %v1837_v30 = vshrl.u32 %v5641_v22, 16 }
 0x10b   : > { %v1839_v10 = vrot.slane %v1837_v30, 1 }
 0x10c   : > { %4648 = vmatmul.mubr.msk.bf16.gmra.mrb[12].mxu1 %vm481_vm2, %v1395_v35  ;;  %v1795_v35 = vshll.u32 %v5588_v55, 16  ;;  %v1414_v55 = vrot.slane %v5232_v41, 1  ;;  %v1858_v41 = vshll.u32 %v5661_v59, 16 }
 0x10d   : > { %4651 = vmatprep.mubr.msk.bf16.mxu1 %vm481_vm2, %v1397_v2  ;;  %v3351_v2 = vrot.slane %v5722_v3, 3  ;;  %v1810_v3 = vshrl.u32 %v5613_v60, 16 }
 0x10e   : > { %v1797_v20 = vrot.slane %v1795_v35, 2  ;;  %v1415_v1 = vsel %vm939_vm5, %v1412_v45, %v1414_v55  ;;  %v3363_v45 = vrot.slane %v5778_v5, 3 }
 0x10f   : > { %4816 = vmatmul.mubr.msk.bf16.gmra.mrb[28].mxu0 %vm481_vm2, %v3044_v29  ;;  %v3352_v29 = vsel %vm3339_vm7, %v3349_v18, %v3351_v2  ;;  %v3354_v61 = vsel %vm3339_vm7, %v3351_v2, %v3353_v44  ;;  %v1812_v9 = vrot.slane %v1810_v3, 1  ;;  %v3373_v3 = vrot.slane %v5822_v14, 3 }
 0x110   : > { %4819 = vmatprep.mubr.msk.bf16.mxu0 %vm481_vm2, %v3053_v51  ;;  %v1798_v19 = vor.u32 %v1797_v20, %v1794_v32  ;;  %v1803_v51 = vrot.slane %v1801_v40, 1  ;;  %v3369_v40 = vrot.slane %v5805_v43, 3 }
 0x112   : > { %v1799_v57 = vsel %vm1692_vm3, %v5502_v15, %v1798_v19  ;;  %v1807_v60 = vor.u32 %v1806_v16, %v1803_v51  ;;  %v1831_v15 = vshll.u32 %v5629_v12, 16 }
 0x114   : > { %4652 = vmatmul.mubr.msk.bf16.gmra.mrb[16].mxu1 %vm481_vm2, %v1399_v63  ;;  %v3355_v63 = vrot.slane %v5740_v13, 3  ;;  %v1828_v13 = vshrl.u32 %v5629_v12, 16  ;;  %v1808_v8 = vsel %vm1692_vm3, %v1798_v19, %v1807_v60  ;;  %v1833_v11 = vrot.slane %v1831_v15, 2 }
 0x115   : > { %4655 = vmatprep.mubr.msk.bf16.mxu1 %vm481_vm2, %v1401_v17  ;;  %v1815_v17 = vrot.slane %v1813_v33, 2 }
 0x116   : > { %v1830_v4 = vrot.slane %v1828_v13, 1 }
 0x117   : > { %4820 = vmatmul.mubr.msk.bf16.gmra.mrb[32].mxu0 %vm481_vm2, %v3062_v31  ;;  %v3356_v31 = vsel %vm3339_vm7, %v3353_v44, %v3355_v63  ;;  %v1816_v56 = vor.u32 %v1815_v17, %v1812_v9  ;;  %v3367_v44 = vrot.slane %v5800_v36, 3  ;;  %v3371_v36 = vrot.slane %v5818_v62, 3 }
 0x118   : > { %4825 = vmatprep.mubr.msk.bf16.mxu0 %vm481_vm2, %v3342_v58  ;;  %v3358_v58 = vsel %vm3339_vm7, %v3355_v63, %v3357_v48  ;;  %v1834_v50 = vor.u32 %v1833_v11, %v1830_v4 }
 0x119   : > { %v1817_v7 = vsel %vm1692_vm3, %v1807_v60, %v1816_v56  ;;  %v3372_v43 = vsel %vm3339_vm7, %v3369_v40, %v3371_v36  ;;  %v3374_v33 = vsel %vm3339_vm7, %v3371_v36, %v3373_v3 }
 0x11c   : > { %4656 = vmatmul.mubr.msk.bf16.gmra.mrb[20].mxu1 %vm481_vm2, %v1403_v34  ;;  %v1821_v34 = vrot.slane %v1819_v24, 1 }
 0x11d   : > { %4659 = vmatprep.mubr.msk.bf16.mxu1 %vm481_vm2, %v1405_v49  ;;  %v3359_v49 = vrot.slane %v5758_v47, 3  ;;  %v1846_v47 = vshrl.u32 %v5645_v26, 16 }
 0x11e   : > { %v1825_v12 = vor.u32 %v1824_v38, %v1821_v34 }
 0x11f   : > { %4826 = vmatmul.mubr.msk.bf16.vlgmr.msra.gmra.mrb[0].mxu0 %vm481_vm2, %v3344_v6  ;;  %v3361_v6 = vrot.slane %v5763_v52, 3  ;;  %v1848_v23 = vrot.slane %v1846_v47, 1 }
 0x120   : > { %4829 = vmatprep.mubr.msk.bf16.mxu0 %vm481_vm2, %v3346_v42  ;;  %v1840_v42 = vshll.u32 %v5641_v22, 16  ;;  %v1826_v52 = vsel %vm1692_vm3, %v1816_v56, %v1825_v12  ;;  %v1835_v22 = vsel %vm1692_vm3, %v1825_v12, %v1834_v50 }
 0x121   : > { %v3362_v18 = vsel %vm3339_vm7, %v3359_v49, %v3361_v6  ;;  %v3364_v2 = vsel %vm3339_vm7, %v3361_v6, %v3363_v45 }
 0x124   : > { %4660 = vmatmul.mubr.msk.bf16.gmra.mrb[24].mxu1 %vm481_vm2, %v1407_v46  ;;  %v3360_v46 = vsel %vm3339_vm7, %v3357_v48, %v3359_v49  ;;  %v6118_v49 = vld [vmem:[%s6251_s2] ss:$0 sm:$0xff] }
 0x125   : > { %4663 = vmatprep.mubr.msk.bf16.mxu1 %vm481_vm2, %v1409_v37  ;;  %v1849_v37 = vshll.u32 %v5645_v26, 16 }
 0x127   : > { %4830 = vmatmul.mubr.msk.bf16.gmra.mrb[4].mxu0 %vm481_vm2, %v3348_v25  ;;  %v1842_v25 = vrot.slane %v1840_v42, 2  ;;  %v1851_v35 = vrot.slane %v1849_v37, 2 }
 0x128   : > { %4833 = vmatprep.mubr.msk.bf16.mxu0 %vm481_vm2, %v3350_v53  ;;  %v3365_v53 = vrot.slane %v5787_v21, 3  ;;  %v1860_v21 = vrot.slane %v1858_v41, 2 }
 0x129   : > { %v1843_v26 = vor.u32 %v1842_v25, %v1839_v10 }
 0x12a   : > { %v3366_v5 = vsel %vm3339_vm7, %v3363_v45, %v3365_v53  ;;  %v3368_v39 = vsel %vm3339_vm7, %v3365_v53, %v3367_v44 }
 0x12b   : > { %v1844_v32 = vsel %vm1692_vm3, %v1834_v50, %v1843_v26 }
 0x12c   : > { %4664 = vmatmul.mubr.msk.bf16.gmra.mrb[28].mxu1 %vm481_vm2, %v1411_v28  ;;  %v1855_v28 = vshrl.u32 %v5661_v59, 16 }
 0x12d   : > { %4667 = vmatprep.mubr.msk.bf16.mxu1 %vm481_vm2, %v1413_v27  ;;  %v1852_v27 = vor.u32 %v1851_v35, %v1848_v23 }
 0x12e   : > { %v1857_v20 = vrot.slane %v1855_v28, 1 }
 0x12f   : > { %4834 = vmatmul.mubr.msk.bf16.gmra.mrb[8].mxu0 %vm481_vm2, %v3352_v29  ;;  %v1853_v55 = vsel %vm1692_vm3, %v1843_v26, %v1852_v27  ;;  %v3370_v29 = vsel %vm3339_vm7, %v3367_v44, %v3369_v40 }
 0x130   : > { %4837 = vmatprep.mubr.msk.bf16.mxu0 %vm481_vm2, %v3354_v61  ;;  %v1861_v59 = vor.u32 %v1860_v21, %v1857_v20  ;;  %v3375_v61 = vrot.slane %v5958_v0, 3 }
 0x132   : > { %v1862_v19 = vsel %vm1692_vm3, %v1852_v27, %v1861_v59 }
 0x134   : > { %4668 = vmatmul.mubr.msk.bf16.gmra.mrb[32].mxu1 %vm481_vm2, %v1415_v1  ;;  %v3376_v1 = vsel %vm3339_vm7, %v3373_v3, %v3375_v61 }
 0x135   : > { %4693 = vmatprep.mubr.msk.bf16.mxu1 %vm481_vm2, %v1799_v57 }
 0x137   : > { %4838 = vmatmul.mubr.msk.bf16.gmra.mrb[12].mxu0 %vm481_vm2, %v3356_v31 }
 0x138   : > { %4841 = vmatprep.mubr.msk.bf16.mxu0 %vm481_vm2, %v3358_v58 }
 0x13c   : > { %4694 = vmatmul.mubr.msk.bf16.vlgmr.msra.gmra.mrb[20].mxu1 %vm481_vm2, %v1808_v8 }
 0x13d   : > { %4697 = vmatprep.mubr.msk.bf16.mxu1 %vm481_vm2, %v1817_v7 }
 0x13f   : > { %4842 = vmatmul.mubr.msk.bf16.gmra.mrb[16].mxu0 %vm481_vm2, %v3360_v46 }
 0x140   : > { %4845 = vmatprep.mubr.msk.bf16.mxu0 %vm481_vm2, %v3362_v18 }
 0x144   : > { %4698 = vmatmul.mubr.msk.bf16.gmra.mrb[24].mxu1 %vm481_vm2, %v1826_v52 }
 0x145   : > { %4701 = vmatprep.mubr.msk.bf16.mxu1 %vm481_vm2, %v1835_v22 }
 0x147   : > { %4846 = vmatmul.mubr.msk.bf16.gmra.mrb[20].mxu0 %vm481_vm2, %v3364_v2 }
 0x148   : > { %4849 = vmatprep.mubr.msk.bf16.mxu0 %vm481_vm2, %v3366_v5 }
 0x14c   : > { %4702 = vmatmul.mubr.msk.bf16.gmra.mrb[28].mxu1 %vm481_vm2, %v1844_v32 }
 0x14d   : > { %4705 = vmatprep.mubr.msk.bf16.mxu1 %vm481_vm2, %v1853_v55 }
 0x14f   : > { %4850 = vmatmul.mubr.msk.bf16.gmra.mrb[24].mxu0 %vm481_vm2, %v3368_v39 }
 0x150   : > { %4853 = vmatprep.mubr.msk.bf16.mxu0 %vm481_vm2, %v3370_v29 }
 0x154   : > { %4706 = vmatmul.mubr.msk.bf16.gmra.mrb[32].mxu1 %vm481_vm2, %v1862_v19 }
 0x157   : > { %4854 = vmatmul.mubr.msk.bf16.gmra.mrb[28].mxu0 %vm481_vm2, %v3372_v43 }
 0x158   : > { %4857 = vmatprep.mubr.msk.bf16.mxu0 %vm481_vm2, %v3374_v33 }
 0x15f   : > { %4858 = vmatmul.mubr.msk.bf16.gmra.mrb[32].mxu0 %vm481_vm2, %v3376_v1 }
 0x1c7   : > { %v4637_v51 = vpop.f32.mrb[0].mxu1 }
 0x1c8   : > { %v1507_v62 = vpop.f32.mrb[1].mxu1 }
 0x1c9   : > { %v4638_v16 = vpop.f32.mrb[2].mxu1 }
 0x1ca   : > { %v1510_v14 = vpop.f32.mrb[3].mxu1 }
 0x1cf   : > { %v4641_v63 = vpop.f32.mrb[4].mxu1 }
 0x1d0   : > { %v1523_v57 = vpop.f32.mrb[5].mxu1 }
 0x1d1   : > { %v4642_v9 = vpop.f32.mrb[6].mxu1 }
 0x1d2   : > { %v1526_v17 = vpop.f32.mrb[7].mxu1 }
 0x1d7   : > { %v6091_v48 = vpop.f32.mrb[8].mxu1 }
 0x1d8   : > { %v6093_v60 = vpop.f32.mrb[9].mxu1 }
 0x1d9   : > { %v6095_v24 = vpop.f32.mrb[10].mxu1 }
 0x1da   : > { %v6097_v0 = vpop.f32.mrb[11].mxu1 }
 0x1df   : > { %v6099_v54 = vpop.f32.mrb[12].mxu1 }
 0x1e0   : > { %v6101_v31 = vpop.f32.mrb[13].mxu1 }
 0x1e1   : > { %v6103_v56 = vpop.f32.mrb[14].mxu1 }
 0x1e2   : > { %v6105_v13 = vpop.f32.mrb[15].mxu1 }
 0x1e7   : > { %v6107_v15 = vpop.f32.mrb[16].mxu1 }
 0x1e8   : > { %v6109_v58 = vpop.f32.mrb[17].mxu1 }
 0x1e9   : > { %v6111_v8 = vpop.f32.mrb[18].mxu1 }
 0x1ea   : > { %v6113_v34 = vpop.f32.mrb[19].mxu1 }
 0x1f2   : > { %v4827_v38 = vpop.f32.mrb[0].mxu0 }
 0x1f3   : > { %v4863_v7 = vadd.f32 %v4827_v38, %v4637_v51  ;;  %v3468_v4 = vpop.f32.mrb[1].mxu0 }
 0x1f4   : > { %v4864_v11 = vadd.f32 %v3468_v4, %v1507_v62  ;;  %v4828_v6 = vpop.f32.mrb[2].mxu0 }
 0x1f5   : > { %v3656_v12 = vadd.f32 %v4863_v7, %v6118_v49  ;;  %v4865_v30 = vadd.f32 %v4828_v6, %v4638_v16  ;;  %v3471_v42 = vpop.f32.mrb[3].mxu0 }
 0x1f6   : > { %v3654_v46 = vadd.f32 %v4864_v11, %v6118_v49  ;;  %v4866_v50 = vadd.f32 %v3471_v42, %v1510_v14 }
 0x1f7   : > { %vm3692_vm8 = vcmp.ge.f32.partialorder %v3656_v12, 0.0  ;;  %v3728_v47 = vmul.f32 0.2, %v3656_v12  ;;  %v3657_v37 = vadd.f32 %v4865_v30, %v6118_v49 }
 0x1f8   : > { %vm3690_vm9 = vcmp.ge.f32.partialorder %v3654_v46, 0.0  ;;  %v3726_v18 = vmul.f32 0.2, %v3654_v46  ;;  %v3655_v52 = vadd.f32 %v4866_v50, %v6118_v49 }
 0x1f9   : > { %v3764_v10 = vsel %vm3692_vm8, %v3656_v12, %v3728_v47  ;;  %vm3693_vm11 = vcmp.ge.f32.partialorder %v3657_v37, 0.0  ;;  %v3729_v25 = vmul.f32 0.2, %v3657_v37 }
 0x1fa   : > { %v4314_v45 = vpack.c.bf16 %v3764_v10, %v3764_v10  ;;  %v3762_v22 = vsel %vm3690_vm9, %v3654_v46, %v3726_v18  ;;  %vm3691_vm12 = vcmp.ge.f32.partialorder %v3655_v52, 0.0  ;;  %v3727_v23 = vmul.f32 0.2, %v3655_v52  ;;  %v4831_v35 = vpop.f32.mrb[4].mxu0 }
 0x1fb   : > { %v4312_v53 = vpack.c.bf16 %v3762_v22, %v3762_v22  ;;  %v3765_v26 = vsel %vm3693_vm11, %v3657_v37, %v3729_v25  ;;  %v4867_v28 = vadd.f32 %v4831_v35, %v4641_v63  ;;  %v3484_v41 = vpop.f32.mrb[5].mxu0 }
 0x1fc   : > { %3945 = vst.msk [vmem:[%s6128_s20 + $0x8] sm:$0xf] %vm3942_vm10, %v4314_v45  ;;  %v4315_v2 = vpack.c.bf16 %v3765_v26, %v3765_v26  ;;  %v3763_v27 = vsel %vm3691_vm12, %v3655_v52, %v3727_v23  ;;  %v4868_v5 = vadd.f32 %v3484_v41, %v1523_v57  ;;  %v4832_v32 = vpop.f32.mrb[6].mxu0 }
 0x1fd   : > { %3943 = vst.msk [vmem:[%s6128_s20] sm:$0xf] %vm3942_vm10, %v4312_v53  ;;  %v4313_v20 = vpack.c.bf16 %v3763_v27, %v3763_v27  ;;  %v3660_v21 = vadd.f32 %v4867_v28, %v6118_v49  ;;  %v4869_v44 = vadd.f32 %v4832_v32, %v4642_v9  ;;  %v3487_v55 = vpop.f32.mrb[7].mxu0 }
 0x1fe   : > { %3946 = vst.msk [vmem:[%s6128_s20 + $0xc] sm:$0xf] %vm3942_vm10, %v4315_v2  ;;  %v3658_v40 = vadd.f32 %v4868_v5, %v6118_v49  ;;  %v4870_v59 = vadd.f32 %v3487_v55, %v1526_v17 }
 0x1ff   : > { %3944 = vst.msk [vmem:[%s6128_s20 + $0x4] sm:$0xf] %vm3942_vm10, %v4313_v20  ;;  %vm3696_vm13 = vcmp.ge.f32.partialorder %v3660_v21, 0.0  ;;  %v3732_v39 = vmul.f32 0.2, %v3660_v21  ;;  %v3661_v29 = vadd.f32 %v4869_v44, %v6118_v49 }
 0x200   : > { %vm3694_vm14 = vcmp.ge.f32.partialorder %v3658_v40, 0.0  ;;  %v3730_v19 = vmul.f32 0.2, %v3658_v40  ;;  %v3659_v36 = vadd.f32 %v4870_v59, %v6118_v49 }
 0x201   : > { %v3768_v3 = vsel %vm3696_vm13, %v3660_v21, %v3732_v39  ;;  %vm3697_vm15 = vcmp.ge.f32.partialorder %v3661_v29, 0.0  ;;  %v3733_v43 = vmul.f32 0.2, %v3661_v29 }
 0x202   : > { %v4318_v33 = vpack.c.bf16 %v3768_v3, %v3768_v3  ;;  %v3766_v61 = vsel %vm3694_vm14, %v3658_v40, %v3730_v19  ;;  %vm3695_vm0 = vcmp.ge.f32.partialorder %v3659_v36, 0.0  ;;  %v3731_v1 = vmul.f32 0.2, %v3659_v36  ;;  %v4835_v51 = vpop.f32.mrb[8].mxu0 }
 0x203   : > { %v4316_v62 = vpack.c.bf16 %v3766_v61, %v3766_v61  ;;  %v3769_v16 = vsel %vm3697_vm15, %v3661_v29, %v3733_v43  ;;  %v4871_v14 = vadd.f32 %v4835_v51, %v6091_v48  ;;  %v3500_v63 = vpop.f32.mrb[9].mxu0 }
 0x204   : > { %3949 = vst.msk [vmem:[%s6128_s20 + $0x18] sm:$0xf] %vm3942_vm10, %v4318_v33  ;;  %v4319_v57 = vpack.c.bf16 %v3769_v16, %v3769_v16  ;;  %v3767_v9 = vsel %vm3695_vm0, %v3659_v36, %v3731_v1  ;;  %v4872_v17 = vadd.f32 %v3500_v63, %v6093_v60  ;;  %v4836_v38 = vpop.f32.mrb[10].mxu0 }
 0x205   : > { %3947 = vst.msk [vmem:[%s6128_s20 + $0x10] sm:$0xf] %vm3942_vm10, %v4316_v62  ;;  %v4317_v7 = vpack.c.bf16 %v3767_v9, %v3767_v9  ;;  %v3664_v4 = vadd.f32 %v4871_v14, %v6118_v49  ;;  %v4873_v11 = vadd.f32 %v4836_v38, %v6095_v24  ;;  %v3503_v6 = vpop.f32.mrb[11].mxu0 }
 0x206   : > { %3950 = vst.msk [vmem:[%s6128_s20 + $0x1c] sm:$0xf] %vm3942_vm10, %v4319_v57  ;;  %v3662_v48 = vadd.f32 %v4872_v17, %v6118_v49  ;;  %v4874_v12 = vadd.f32 %v3503_v6, %v6097_v0 }
 0x207   : > { %3948 = vst.msk [vmem:[%s6128_s20 + $0x14] sm:$0xf] %vm3942_vm10, %v4317_v7  ;;  %vm3700_vm1 = vcmp.ge.f32.partialorder %v3664_v4, 0.0  ;;  %v3736_v30 = vmul.f32 0.2, %v3664_v4  ;;  %v3665_v60 = vadd.f32 %v4873_v11, %v6118_v49 }
 0x208   : > { %vm3698_vm2 = vcmp.ge.f32.partialorder %v3662_v48, 0.0  ;;  %v3734_v42 = vmul.f32 0.2, %v3662_v48  ;;  %v3663_v46 = vadd.f32 %v4874_v12, %v6118_v49 }
 0x209   : > { %v3772_v50 = vsel %vm3700_vm1, %v3664_v4, %v3736_v30  ;;  %vm3701_vm3 = vcmp.ge.f32.partialorder %v3665_v60, 0.0  ;;  %v3737_v24 = vmul.f32 0.2, %v3665_v60 }
 0x20a   : > { %v4322_v47 = vpack.c.bf16 %v3772_v50, %v3772_v50  ;;  %v3770_v37 = vsel %vm3698_vm2, %v3662_v48, %v3734_v42  ;;  %vm3699_vm4 = vcmp.ge.f32.partialorder %v3663_v46, 0.0  ;;  %v3735_v18 = vmul.f32 0.2, %v3663_v46  ;;  %v4839_v0 = vpop.f32.mrb[12].mxu0 }
 0x20b   : > { %v4320_v52 = vpack.c.bf16 %v3770_v37, %v3770_v37  ;;  %v3773_v10 = vsel %vm3701_vm3, %v3665_v60, %v3737_v24  ;;  %v4875_v25 = vadd.f32 %v4839_v0, %v6099_v54  ;;  %v3516_v45 = vpop.f32.mrb[13].mxu0 }
 0x20c   : > { %3953 = vst.msk [vmem:[%s6128_s20 + $0x28] sm:$0xf] %vm3942_vm10, %v4322_v47  ;;  %v4323_v22 = vpack.c.bf16 %v3773_v10, %v3773_v10  ;;  %v3771_v23 = vsel %vm3699_vm4, %v3663_v46, %v3735_v18  ;;  %v4876_v35 = vadd.f32 %v3516_v45, %v6101_v31  ;;  %v4840_v53 = vpop.f32.mrb[14].mxu0 }
 0x20d   : > { %3951 = vst.msk [vmem:[%s6128_s20 + $0x20] sm:$0xf] %vm3942_vm10, %v4320_v52  ;;  %v4321_v26 = vpack.c.bf16 %v3771_v23, %v3771_v23  ;;  %v3668_v28 = vadd.f32 %v4875_v25, %v6118_v49  ;;  %v4877_v41 = vadd.f32 %v4840_v53, %v6103_v56  ;;  %v3519_v2 = vpop.f32.mrb[15].mxu0 }
 0x20e   : > { %3954 = vst.msk [vmem:[%s6128_s20 + $0x2c] sm:$0xf] %vm3942_vm10, %v4323_v22  ;;  %v3666_v54 = vadd.f32 %v4876_v35, %v6118_v49  ;;  %v4878_v5 = vadd.f32 %v3519_v2, %v6105_v13 }
 0x20f   : > { %v4695_v27 = vpop.f32.mrb[20].mxu1  ;;  %3952 = vst.msk [vmem:[%s6128_s20 + $0x24] sm:$0xf] %vm3942_vm10, %v4321_v26  ;;  %vm3704_vm5 = vcmp.ge.f32.partialorder %v3668_v28, 0.0  ;;  %v3740_v31 = vmul.f32 0.2, %v3668_v28  ;;  %v3669_v20 = vadd.f32 %v4877_v41, %v6118_v49 }
 0x210   : > { %v2034_v32 = vpop.f32.mrb[21].mxu1  ;;  %vm3702_vm6 = vcmp.ge.f32.partialorder %v3666_v54, 0.0  ;;  %v3738_v44 = vmul.f32 0.2, %v3666_v54  ;;  %v3667_v56 = vadd.f32 %v4878_v5, %v6118_v49 }
 0x211   : > { %v4696_v21 = vpop.f32.mrb[22].mxu1  ;;  %v3776_v40 = vsel %vm3704_vm5, %v3668_v28, %v3740_v31  ;;  %vm3705_vm7 = vcmp.ge.f32.partialorder %v3669_v20, 0.0  ;;  %v3741_v59 = vmul.f32 0.2, %v3669_v20 }
 0x212   : > { %v2037_v55 = vpop.f32.mrb[23].mxu1  ;;  %v4326_v39 = vpack.c.bf16 %v3776_v40, %v3776_v40  ;;  %v3774_v13 = vsel %vm3702_vm6, %v3666_v54, %v3738_v44  ;;  %vm3703_vm8 = vcmp.ge.f32.partialorder %v3667_v56, 0.0  ;;  %v3739_v29 = vmul.f32 0.2, %v3667_v56  ;;  %v4843_v19 = vpop.f32.mrb[16].mxu0 }
 0x213   : > { %v4324_v36 = vpack.c.bf16 %v3774_v13, %v3774_v13  ;;  %v3777_v3 = vsel %vm3705_vm7, %v3669_v20, %v3741_v59  ;;  %v4879_v43 = vadd.f32 %v4843_v19, %v6107_v15  ;;  %v3532_v33 = vpop.f32.mrb[17].mxu0 }
 0x214   : > { %3957 = vst.msk [vmem:[%s6128_s20 + $0x38] sm:$0xf] %vm3942_vm10, %v4326_v39  ;;  %v4327_v61 = vpack.c.bf16 %v3777_v3, %v3777_v3  ;;  %v3775_v1 = vsel %vm3703_vm8, %v3667_v56, %v3739_v29  ;;  %v4880_v51 = vadd.f32 %v3532_v33, %v6109_v58  ;;  %v4844_v62 = vpop.f32.mrb[18].mxu0 }
 0x215   : > { %3955 = vst.msk [vmem:[%s6128_s20 + $0x30] sm:$0xf] %vm3942_vm10, %v4324_v36  ;;  %v4325_v16 = vpack.c.bf16 %v3775_v1, %v3775_v1  ;;  %v3672_v14 = vadd.f32 %v4879_v43, %v6118_v49  ;;  %v4881_v63 = vadd.f32 %v4844_v62, %v6111_v8  ;;  %v3535_v57 = vpop.f32.mrb[19].mxu0 }
 0x216   : > { %3958 = vst.msk [vmem:[%s6128_s20 + $0x3c] sm:$0xf] %vm3942_vm10, %v4327_v61  ;;  %v3670_v15 = vadd.f32 %v4880_v51, %v6118_v49  ;;  %v4882_v17 = vadd.f32 %v3535_v57, %v6113_v34 }
 0x217   : > { %v4699_v9 = vpop.f32.mrb[24].mxu1  ;;  %3956 = vst.msk [vmem:[%s6128_s20 + $0x34] sm:$0xf] %vm3942_vm10, %v4325_v16  ;;  %vm3708_vm9 = vcmp.ge.f32.partialorder %v3672_v14, 0.0  ;;  %v3744_v58 = vmul.f32 0.2, %v3672_v14  ;;  %v3673_v7 = vadd.f32 %v4881_v63, %v6118_v49 }
 0x218   : > { %v2050_v38 = vpop.f32.mrb[25].mxu1  ;;  %vm3706_vm11 = vcmp.ge.f32.partialorder %v3670_v15, 0.0  ;;  %v3742_v11 = vmul.f32 0.2, %v3670_v15  ;;  %v3671_v8 = vadd.f32 %v4882_v17, %v6118_v49 }
 0x219   : > { %v4700_v4 = vpop.f32.mrb[26].mxu1  ;;  %v3780_v48 = vsel %vm3708_vm9, %v3672_v14, %v3744_v58  ;;  %vm3709_vm12 = vcmp.ge.f32.partialorder %v3673_v7, 0.0  ;;  %v3745_v12 = vmul.f32 0.2, %v3673_v7 }
 0x21a   : > { %v2053_v6 = vpop.f32.mrb[27].mxu1  ;;  %v4330_v30 = vpack.c.bf16 %v3780_v48, %v3780_v48  ;;  %v3778_v34 = vsel %vm3706_vm11, %v3670_v15, %v3742_v11  ;;  %vm3707_vm13 = vcmp.ge.f32.partialorder %v3671_v8, 0.0  ;;  %v3743_v60 = vmul.f32 0.2, %v3671_v8  ;;  %v4847_v42 = vpop.f32.mrb[20].mxu0 }
 0x21b   : > { %v4328_v46 = vpack.c.bf16 %v3778_v34, %v3778_v34  ;;  %v3781_v50 = vsel %vm3709_vm12, %v3673_v7, %v3745_v12  ;;  %v4883_v24 = vadd.f32 %v4847_v42, %v4695_v27  ;;  %v3548_v47 = vpop.f32.mrb[21].mxu0 }
 0x21c   : > { %3961 = vst.msk [vmem:[%s6128_s20 + $0x48] sm:$0xf] %vm3942_vm10, %v4330_v30  ;;  %v4331_v37 = vpack.c.bf16 %v3781_v50, %v3781_v50  ;;  %v3779_v18 = vsel %vm3707_vm13, %v3671_v8, %v3743_v60  ;;  %v4884_v0 = vadd.f32 %v3548_v47, %v2034_v32  ;;  %v4848_v52 = vpop.f32.mrb[22].mxu0 }
 0x21d   : > { %3959 = vst.msk [vmem:[%s6128_s20 + $0x40] sm:$0xf] %vm3942_vm10, %v4328_v46  ;;  %v4329_v10 = vpack.c.bf16 %v3779_v18, %v3779_v18  ;;  %v3676_v25 = vadd.f32 %v4883_v24, %v6118_v49  ;;  %v4885_v45 = vadd.f32 %v4848_v52, %v4696_v21  ;;  %v3551_v22 = vpop.f32.mrb[23].mxu0 }
 0x21e   : > { %3962 = vst.msk [vmem:[%s6128_s20 + $0x4c] sm:$0xf] %vm3942_vm10, %v4331_v37  ;;  %v3674_v35 = vadd.f32 %v4884_v0, %v6118_v49  ;;  %v4886_v53 = vadd.f32 %v3551_v22, %v2037_v55 }
 0x21f   : > { %v4703_v23 = vpop.f32.mrb[28].mxu1  ;;  %3960 = vst.msk [vmem:[%s6128_s20 + $0x44] sm:$0xf] %vm3942_vm10, %v4329_v10  ;;  %vm3712_vm14 = vcmp.ge.f32.partialorder %v3676_v25, 0.0  ;;  %v3748_v28 = vmul.f32 0.2, %v3676_v25  ;;  %v3677_v41 = vadd.f32 %v4885_v45, %v6118_v49 }
 0x220   : > { %v2066_v26 = vpop.f32.mrb[29].mxu1  ;;  %vm3710_vm15 = vcmp.ge.f32.partialorder %v3674_v35, 0.0  ;;  %v3746_v27 = vmul.f32 0.2, %v3674_v35  ;;  %v3675_v54 = vadd.f32 %v4886_v53, %v6118_v49 }
 0x221   : > { %v4704_v2 = vpop.f32.mrb[30].mxu1  ;;  %v3784_v32 = vsel %vm3712_vm14, %v3676_v25, %v3748_v28  ;;  %vm3713_vm0 = vcmp.ge.f32.partialorder %v3677_v41, 0.0  ;;  %v3749_v31 = vmul.f32 0.2, %v3677_v41 }
 0x222   : > { %v2069_v5 = vpop.f32.mrb[31].mxu1  ;;  %v4334_v20 = vpack.c.bf16 %v3784_v32, %v3784_v32  ;;  %v3782_v21 = vsel %vm3710_vm15, %v3674_v35, %v3746_v27  ;;  %vm3711_vm1 = vcmp.ge.f32.partialorder %v3675_v54, 0.0  ;;  %v3747_v44 = vmul.f32 0.2, %v3675_v54  ;;  %v4851_v56 = vpop.f32.mrb[24].mxu0 }
 0x223   : > { %v4332_v55 = vpack.c.bf16 %v3782_v21, %v3782_v21  ;;  %v3785_v40 = vsel %vm3713_vm0, %v3677_v41, %v3749_v31  ;;  %v4887_v59 = vadd.f32 %v4851_v56, %v4699_v9  ;;  %v3564_v39 = vpop.f32.mrb[25].mxu0 }
 0x224   : > { %3965 = vst.msk [vmem:[%s6128_s20 + $0x58] sm:$0xf] %vm3942_vm10, %v4334_v20  ;;  %v4335_v13 = vpack.c.bf16 %v3785_v40, %v3785_v40  ;;  %v3783_v29 = vsel %vm3711_vm1, %v3675_v54, %v3747_v44  ;;  %v4888_v19 = vadd.f32 %v3564_v39, %v2050_v38  ;;  %v4852_v36 = vpop.f32.mrb[26].mxu0 }
 0x225   : > { %3963 = vst.msk [vmem:[%s6128_s20 + $0x50] sm:$0xf] %vm3942_vm10, %v4332_v55  ;;  %v4333_v3 = vpack.c.bf16 %v3783_v29, %v3783_v29  ;;  %v3680_v43 = vadd.f32 %v4887_v59, %v6118_v49  ;;  %v4889_v33 = vadd.f32 %v4852_v36, %v4700_v4  ;;  %v3567_v61 = vpop.f32.mrb[27].mxu0 }
 0x226   : > { %3966 = vst.msk [vmem:[%s6128_s20 + $0x5c] sm:$0xf] %vm3942_vm10, %v4335_v13  ;;  %v3678_v51 = vadd.f32 %v4888_v19, %v6118_v49  ;;  %v4890_v62 = vadd.f32 %v3567_v61, %v2053_v6 }
 0x227   : > { %v4707_v1 = vpop.f32.mrb[32].mxu1  ;;  %3964 = vst.msk [vmem:[%s6128_s20 + $0x54] sm:$0xf] %vm3942_vm10, %v4333_v3  ;;  %vm3716_vm2 = vcmp.ge.f32.partialorder %v3680_v43, 0.0  ;;  %v3752_v14 = vmul.f32 0.2, %v3680_v43  ;;  %v3681_v63 = vadd.f32 %v4889_v33, %v6118_v49 }
 0x228   : > { %v2082_v16 = vpop.f32.mrb[33].mxu1  ;;  %vm3714_vm3 = vcmp.ge.f32.partialorder %v3678_v51, 0.0  ;;  %v3750_v9 = vmul.f32 0.2, %v3678_v51  ;;  %v3679_v15 = vadd.f32 %v4890_v62, %v6118_v49 }
 0x229   : > { %v4708_v57 = vpop.f32.mrb[34].mxu1  ;;  %v3788_v38 = vsel %vm3716_vm2, %v3680_v43, %v3752_v14  ;;  %vm3717_vm4 = vcmp.ge.f32.partialorder %v3681_v63, 0.0  ;;  %v3753_v58 = vmul.f32 0.2, %v3681_v63 }
 0x22a   : > { %v2085_v17 = vpop.f32.mrb[35].mxu1  ;;  %v4338_v7 = vpack.c.bf16 %v3788_v38, %v3788_v38  ;;  %v3786_v4 = vsel %vm3714_vm3, %v3678_v51, %v3750_v9  ;;  %vm3715_vm5 = vcmp.ge.f32.partialorder %v3679_v15, 0.0  ;;  %v3751_v11 = vmul.f32 0.2, %v3679_v15  ;;  %v4855_v8 = vpop.f32.mrb[28].mxu0 }
 0x22b   : > { %v4336_v6 = vpack.c.bf16 %v3786_v4, %v3786_v4  ;;  %v3789_v48 = vsel %vm3717_vm4, %v3681_v63, %v3753_v58  ;;  %v4891_v12 = vadd.f32 %v4855_v8, %v4703_v23  ;;  %v3580_v30 = vpop.f32.mrb[29].mxu0 }
 0x22c   : > { %3969 = vst.msk [vmem:[%s6128_s20 + $0x68] sm:$0xf] %vm3942_vm10, %v4338_v7  ;;  %v4339_v34 = vpack.c.bf16 %v3789_v48, %v3789_v48  ;;  %v3787_v60 = vsel %vm3715_vm5, %v3679_v15, %v3751_v11  ;;  %v4892_v42 = vadd.f32 %v3580_v30, %v2066_v26  ;;  %v4856_v46 = vpop.f32.mrb[30].mxu0 }
 0x22d   : > { %3967 = vst.msk [vmem:[%s6128_s20 + $0x60] sm:$0xf] %vm3942_vm10, %v4336_v6  ;;  %v4337_v50 = vpack.c.bf16 %v3787_v60, %v3787_v60  ;;  %v3684_v24 = vadd.f32 %v4891_v12, %v6118_v49  ;;  %v4893_v47 = vadd.f32 %v4856_v46, %v4704_v2  ;;  %v3583_v37 = vpop.f32.mrb[31].mxu0 }
 0x22e   : > { %3970 = vst.msk [vmem:[%s6128_s20 + $0x6c] sm:$0xf] %vm3942_vm10, %v4339_v34  ;;  %v3682_v18 = vadd.f32 %v4892_v42, %v6118_v49  ;;  %v4894_v0 = vadd.f32 %v3583_v37, %v2069_v5 }
 0x22f   : > { %3968 = vst.msk [vmem:[%s6128_s20 + $0x64] sm:$0xf] %vm3942_vm10, %v4337_v50  ;;  %vm3720_vm6 = vcmp.ge.f32.partialorder %v3684_v24, 0.0  ;;  %v3756_v52 = vmul.f32 0.2, %v3684_v24  ;;  %v3685_v10 = vadd.f32 %v4893_v47, %v6118_v49 }
 0x230   : > { %vm3718_vm7 = vcmp.ge.f32.partialorder %v3682_v18, 0.0  ;;  %v3754_v25 = vmul.f32 0.2, %v3682_v18  ;;  %v3683_v45 = vadd.f32 %v4894_v0, %v6118_v49 }
 0x231   : > { %v3792_v22 = vsel %vm3720_vm6, %v3684_v24, %v3756_v52  ;;  %vm3721_vm8 = vcmp.ge.f32.partialorder %v3685_v10, 0.0  ;;  %v3757_v23 = vmul.f32 0.2, %v3685_v10 }
 0x232   : > { %v4342_v35 = vpack.c.bf16 %v3792_v22, %v3792_v22  ;;  %v3790_v53 = vsel %vm3718_vm7, %v3682_v18, %v3754_v25  ;;  %vm3719_vm9 = vcmp.ge.f32.partialorder %v3683_v45, 0.0  ;;  %v3755_v26 = vmul.f32 0.2, %v3683_v45  ;;  %v4859_v28 = vpop.f32.mrb[32].mxu0 }
 0x233   : > { %v4340_v41 = vpack.c.bf16 %v3790_v53, %v3790_v53  ;;  %v3793_v2 = vsel %vm3721_vm8, %v3685_v10, %v3757_v23  ;;  %v4895_v27 = vadd.f32 %v4859_v28, %v4707_v1  ;;  %v3596_v54 = vpop.f32.mrb[33].mxu0 }
 0x234   : > { %3973 = vst.msk [vmem:[%s6128_s20 + $0x78] sm:$0xf] %vm3942_vm10, %v4342_v35  ;;  %v4343_v5 = vpack.c.bf16 %v3793_v2, %v3793_v2  ;;  %v3791_v32 = vsel %vm3719_vm9, %v3683_v45, %v3755_v26  ;;  %v4896_v31 = vadd.f32 %v3596_v54, %v2082_v16  ;;  %v4860_v20 = vpop.f32.mrb[34].mxu0 }
 0x235   : > { %3971 = vst.msk [vmem:[%s6128_s20 + $0x70] sm:$0xf] %vm3942_vm10, %v4340_v41  ;;  %v4341_v21 = vpack.c.bf16 %v3791_v32, %v3791_v32  ;;  %v3688_v44 = vadd.f32 %v4895_v27, %v6118_v49  ;;  %v4897_v56 = vadd.f32 %v4860_v20, %v4708_v57  ;;  %v3599_v55 = vpop.f32.mrb[35].mxu0 }
 0x236   : > { %3974 = vst.msk [vmem:[%s6128_s20 + $0x7c] sm:$0xf] %vm3942_vm10, %v4343_v5  ;;  %v3686_v40 = vadd.f32 %v4896_v31, %v6118_v49  ;;  %v4898_v59 = vadd.f32 %v3599_v55, %v2085_v17 }
 0x237   : > { %3972 = vst.msk [vmem:[%s6128_s20 + $0x74] sm:$0xf] %vm3942_vm10, %v4341_v21  ;;  %vm3724_vm11 = vcmp.ge.f32.partialorder %v3688_v44, 0.0  ;;  %v3760_v39 = vmul.f32 0.2, %v3688_v44  ;;  %v3689_v13 = vadd.f32 %v4897_v56, %v6118_v49 }
 0x238   : > { %vm3722_vm12 = vcmp.ge.f32.partialorder %v3686_v40, 0.0  ;;  %v3758_v29 = vmul.f32 0.2, %v3686_v40  ;;  %v3687_v19 = vadd.f32 %v4898_v59, %v6118_v49 }
 0x239   : > { %v3796_v36 = vsel %vm3724_vm11, %v3688_v44, %v3760_v39  ;;  %vm3725_vm13 = vcmp.ge.f32.partialorder %v3689_v13, 0.0  ;;  %v3761_v3 = vmul.f32 0.2, %v3689_v13 }
 0x23a   : > { %v4346_v43 = vpack.c.bf16 %v3796_v36, %v3796_v36  ;;  %v3794_v33 = vsel %vm3722_vm12, %v3686_v40, %v3758_v29  ;;  %vm3723_vm14 = vcmp.ge.f32.partialorder %v3687_v19, 0.0  ;;  %v3759_v61 = vmul.f32 0.2, %v3687_v19 }
 0x23b   : > { %v4344_v1 = vpack.c.bf16 %v3794_v33, %v3794_v33  ;;  %v3797_v51 = vsel %vm3725_vm13, %v3689_v13, %v3761_v3 }
 0x23c   : > { %3977 = vst.msk [vmem:[%s6128_s20 + $0x88] sm:$0xf] %vm3942_vm10, %v4346_v43  ;;  %v4347_v62 = vpack.c.bf16 %v3797_v51, %v3797_v51  ;;  %v3795_v16 = vsel %vm3723_vm14, %v3687_v19, %v3759_v61 }
 0x23d   : > { %3975 = vst.msk [vmem:[%s6128_s20 + $0x80] sm:$0xf] %vm3942_vm10, %v4344_v1  ;;  %v4345_v14 = vpack.c.bf16 %v3795_v16, %v3795_v16 }
 0x23e   : > { %3978 = vst.msk [vmem:[%s6128_s20 + $0x8c] sm:$0xf] %vm3942_vm10, %v4347_v62 }
 0x23f   : > { %3976 = vst.msk [vmem:[%s6128_s20 + $0x84] sm:$0xf] %vm3942_vm10, %v4345_v14 }
 0x240 PF: > { %s14_s15 = sadd.s32 1, %s5250_s15  }
 0x241   : > { %p11_p4 = scmp.ge.s32.totalorder %s14_s15, 4  }
 0x243   :  { %13 = sbr.rel (!%p11_p4) target bundleno = 1 (0x1), region = 74 }

</bundles_post_ra>
